<compile_context>
chip_gen: v7x
topology: tpu7x:2x2x1
jax: 0.10.0
libtpu: 0.0.40
codegen_flags: <defaults>
</compile_context>

<pallas_src>
import functools

import jax
import jax.numpy as jnp
from jax.experimental import pallas as pl
from jax.experimental.pallas import tpu as pltpu


def _round_up(n, m):
    return (n + m - 1) // m * m


def mlp_kernel(x_ref, w1_ref, b1_ref, w2_ref, b2_ref, w3_ref, b3_ref, o_ref):
    # Fused 896 -> 512 -> 384 -> 128 (padded) MLP on one batch tile.
    x = x_ref[...]                                   # (TB, 896) bf16
    h1 = jnp.dot(x, w1_ref[...],
                 preferred_element_type=jnp.float32) + b1_ref[...]
    h1 = jnp.maximum(h1, 0.0)                        # f32 ReLU
    h2 = jnp.dot(h1.astype(w2_ref.dtype), w2_ref[...],
                 preferred_element_type=jnp.float32) + b2_ref[...]
    h2 = jnp.maximum(h2, 0.0)                        # f32 ReLU
    logits = jnp.dot(h2.astype(w3_ref.dtype), w3_ref[...],
                     preferred_element_type=jnp.float32) + b3_ref[...]
    o_ref[...] = logits.astype(o_ref.dtype)


def neural_network23_forward(x_nchw, params, compute_dtype=jnp.bfloat16):
    """x_nchw: (B, 1, 28, 28) float32 -> logits (B, 10) float32."""
    w1, b1, w2, b2, w3, b3 = params          # w: (in, out), b: (1, out)
    B = x_nchw.shape[0]
    x_flat = x_nchw.reshape(B, -1).astype(jnp.float32)   # nn.Flatten

    IN, H1 = w1.shape                         # 784, 512
    H2 = w2.shape[1]                          # 360
    OUT = w3.shape[1]                         # 10
    IN_P = _round_up(IN, 128)                 # 896
    H2_P = _round_up(H2, 128)                 # 384
    OUT_P = _round_up(OUT, 128)               # 128 (lane-dense output stores)

    # Batch tile: large enough to amortize per-step overhead, 8-row aligned.
    TB = min(512, _round_up(B, 8))
    B_pad = _round_up(B, TB)

    # Zero-pad to lane-dense shapes; zeros contribute nothing numerically.
    x_p = jnp.pad(x_flat, ((0, B_pad - B), (0, IN_P - IN))).astype(compute_dtype)
    w1_p = jnp.pad(w1, ((0, IN_P - IN), (0, 0))).astype(compute_dtype)            # (896, 512)
    b1_p = b1.astype(jnp.float32)                                                 # (1, 512)
    w2_p = jnp.pad(w2, ((0, 0), (0, H2_P - H2))).astype(compute_dtype)            # (512, 384)
    b2_p = jnp.pad(b2, ((0, 0), (0, H2_P - H2))).astype(jnp.float32)              # (1, 384)
    w3_p = jnp.pad(w3, ((0, H2_P - H2), (0, OUT_P - OUT))).astype(compute_dtype)  # (384, 128)
    b3_p = jnp.pad(b3, ((0, 0), (0, OUT_P - OUT))).astype(jnp.float32)            # (1, 128)

    grid = (B_pad // TB,)

    # x / out tiled over the batch; weights & biases resident (constant index_map).
    x_spec = pl.BlockSpec((TB, IN_P), lambda i: (i, 0))
    resident = lambda arr: pl.BlockSpec(arr.shape, lambda i: (0, 0))
    out_spec = pl.BlockSpec((TB, OUT_P), lambda i: (i, 0))

    itemsize = jnp.dtype(compute_dtype).itemsize
    flops = 2 * B_pad * (IN_P * H1 + H1 * H2_P + H2_P * OUT_P)
    bytes_accessed = (
        x_p.size * itemsize
        + (w1_p.size + w2_p.size + w3_p.size) * itemsize
        + (b1_p.size + b2_p.size + b3_p.size) * 4
        + B_pad * OUT_P * 4
    )

    out = pl.pallas_call(
        mlp_kernel,
        out_shape=jax.ShapeDtypeStruct((B_pad, OUT_P), jnp.float32),
        grid=grid,
        in_specs=[
            x_spec,
            resident(w1_p), resident(b1_p),
            resident(w2_p), resident(b2_p),
            resident(w3_p), resident(b3_p),
        ],
        out_specs=out_spec,
        compiler_params=pltpu.CompilerParams(
            dimension_semantics=("parallel",),
        ),
        cost_estimate=pl.CostEstimate(
            flops=flops, transcendentals=0, bytes_accessed=bytes_accessed),
    )(x_p, w1_p, b1_p, w2_p, b2_p, w3_p, b3_p)

    return out[:B, :OUT]


def init_params(key):
    """PyTorch nn.Linear default init: U(-1/sqrt(fan_in), 1/sqrt(fan_in)).
    Weights stored (in_features, out_features), biases (1, out_features)."""
    dims = [(28 * 28, 512), (512, 360), (360, 10)]
    params = []
    for fan_in, fan_out in dims:
        key, kw, kb = jax.random.split(key, 3)
        bound = 1.0 / jnp.sqrt(jnp.float32(fan_in))
        w = jax.random.uniform(kw, (fan_in, fan_out), jnp.float32, -bound, bound)
        b = jax.random.uniform(kb, (1, fan_out), jnp.float32, -bound, bound)
        params += [w, b]
    return tuple(params)


def reference_forward(x_nchw, params, compute_dtype=jnp.bfloat16):
    """Pure-JAX reference mirroring the kernel numerics (bf16 matmul inputs,
    f32 accumulation, f32 bias/ReLU)."""
    w1, b1, w2, b2, w3, b3 = params
    x = x_nchw.reshape(x_nchw.shape[0], -1)
    h1 = jnp.dot(x.astype(compute_dtype), w1.astype(compute_dtype),
                 preferred_element_type=jnp.float32) + b1
    h1 = jnp.maximum(h1, 0.0)
    h2 = jnp.dot(h1.astype(compute_dtype), w2.astype(compute_dtype),
                 preferred_element_type=jnp.float32) + b2
    h2 = jnp.maximum(h2, 0.0)
    return jnp.dot(h2.astype(compute_dtype), w3.astype(compute_dtype),
                   preferred_element_type=jnp.float32) + b3


if __name__ == "__main__":
    key = jax.random.PRNGKey(0)
    kp, kx = jax.random.split(key)
    params = init_params(kp)

    # Small batch of MNIST-shaped inputs, NCHW like PyTorch.
    x = jax.random.normal(kx, (2, 1, 28, 28), jnp.float32)

    fwd = jax.jit(functools.partial(neural_network23_forward, params=params))
    logits = jax.block_until_ready(fwd(x))

    ref = reference_forward(x, params)
    assert logits.shape == (2, 10), logits.shape
    assert jnp.allclose(logits, ref, atol=1e-3, rtol=1e-3), (
        float(jnp.max(jnp.abs(logits - ref))))
    print("KERNEL_OK")
</pallas_src>

<mosaic_0001>
module attributes {stable_mosaic.version = 11 : i64} {
  func.func @mlp_kernel(%arg0: i32, %arg1: memref<8x896xbf16, #tpu.memory_space<vmem>>, %arg2: memref<896x512xbf16, #tpu.memory_space<vmem>>, %arg3: memref<1x512xf32, #tpu.memory_space<vmem>>, %arg4: memref<512x384xbf16, #tpu.memory_space<vmem>>, %arg5: memref<1x384xf32, #tpu.memory_space<vmem>>, %arg6: memref<384x128xbf16, #tpu.memory_space<vmem>>, %arg7: memref<1x128xf32, #tpu.memory_space<vmem>>, %arg8: memref<8x128xf32, #tpu.memory_space<vmem>>) attributes {dimension_semantics = [#tpu.dimension_semantics<parallel>], iteration_bounds = array<i64: 1>, scalar_prefetch = 0 : i64, scratch_operands = 0 : i64, tpu.core_type = #tpu.core_type<tc>, window_params = [{transform_indices = @transform_0, window_bounds = array<i64: 8, 896>}, {pipeline_mode = #tpu.pipeline_mode<synchronous>, transform_indices = @transform_1, window_bounds = array<i64: 896, 512>}, {pipeline_mode = #tpu.pipeline_mode<synchronous>, transform_indices = @transform_2, window_bounds = array<i64: 1, 512>}, {pipeline_mode = #tpu.pipeline_mode<synchronous>, transform_indices = @transform_3, window_bounds = array<i64: 512, 384>}, {pipeline_mode = #tpu.pipeline_mode<synchronous>, transform_indices = @transform_4, window_bounds = array<i64: 1, 384>}, {pipeline_mode = #tpu.pipeline_mode<synchronous>, transform_indices = @transform_5, window_bounds = array<i64: 384, 128>}, {pipeline_mode = #tpu.pipeline_mode<synchronous>, transform_indices = @transform_6, window_bounds = array<i64: 1, 128>}, {transform_indices = @transform_7, window_bounds = array<i64: 8, 128>}]} {
    %c0 = arith.constant 0 : index
    %c0_0 = arith.constant 0 : index
    %0 = vector.load %arg1[%c0, %c0_0] : memref<8x896xbf16, #tpu.memory_space<vmem>>, vector<8x896xbf16>
    %c0_1 = arith.constant 0 : index
    %c0_2 = arith.constant 0 : index
    %1 = vector.load %arg2[%c0_1, %c0_2] : memref<896x512xbf16, #tpu.memory_space<vmem>>, vector<896x512xbf16>
    %cst = arith.constant dense<0.000000e+00> : vector<8x512xf32>
    %2 = tpu.matmul %0, %1, %cst {dimension_numbers = #tpu.dot_dimension_numbers<[1], [0], [0], [1], [0, 0, 1, 1], [], []>} : vector<8x896xbf16>, vector<896x512xbf16>, vector<8x512xf32> -> vector<8x512xf32>
    %c0_3 = arith.constant 0 : index
    %c0_4 = arith.constant 0 : index
    %3 = vector.load %arg3[%c0_3, %c0_4] : memref<1x512xf32, #tpu.memory_space<vmem>>, vector<1x512xf32>
    %4 = vector.broadcast %3 : vector<1x512xf32> to vector<8x512xf32>
    %5 = arith.addf %2, %4 : vector<8x512xf32>
    %cst_5 = arith.constant 0.000000e+00 : f32
    %6 = vector.broadcast %cst_5 : f32 to vector<8x512xf32>
    %7 = arith.maximumf %5, %6 : vector<8x512xf32>
    %8 = arith.truncf %7 : vector<8x512xf32> to vector<8x512xbf16>
    %c0_6 = arith.constant 0 : index
    %c0_7 = arith.constant 0 : index
    %9 = vector.load %arg4[%c0_6, %c0_7] : memref<512x384xbf16, #tpu.memory_space<vmem>>, vector<512x384xbf16>
    %cst_8 = arith.constant dense<0.000000e+00> : vector<8x384xf32>
    %10 = tpu.matmul %8, %9, %cst_8 {dimension_numbers = #tpu.dot_dimension_numbers<[1], [0], [0], [1], [0, 0, 1, 1], [], []>} : vector<8x512xbf16>, vector<512x384xbf16>, vector<8x384xf32> -> vector<8x384xf32>
    %c0_9 = arith.constant 0 : index
    %c0_10 = arith.constant 0 : index
    %11 = vector.load %arg5[%c0_9, %c0_10] : memref<1x384xf32, #tpu.memory_space<vmem>>, vector<1x384xf32>
    %12 = vector.broadcast %11 : vector<1x384xf32> to vector<8x384xf32>
    %13 = arith.addf %10, %12 : vector<8x384xf32>
    %cst_11 = arith.constant 0.000000e+00 : f32
    %14 = vector.broadcast %cst_11 : f32 to vector<8x384xf32>
    %15 = arith.maximumf %13, %14 : vector<8x384xf32>
    %16 = arith.truncf %15 : vector<8x384xf32> to vector<8x384xbf16>
    %c0_12 = arith.constant 0 : index
    %c0_13 = arith.constant 0 : index
    %17 = vector.load %arg6[%c0_12, %c0_13] : memref<384x128xbf16, #tpu.memory_space<vmem>>, vector<384x128xbf16>
    %cst_14 = arith.constant dense<0.000000e+00> : vector<8x128xf32>
    %18 = tpu.matmul %16, %17, %cst_14 {dimension_numbers = #tpu.dot_dimension_numbers<[1], [0], [0], [1], [0, 0, 1, 1], [], []>} : vector<8x384xbf16>, vector<384x128xbf16>, vector<8x128xf32> -> vector<8x128xf32>
    %c0_15 = arith.constant 0 : index
    %c0_16 = arith.constant 0 : index
    %19 = vector.load %arg7[%c0_15, %c0_16] : memref<1x128xf32, #tpu.memory_space<vmem>>, vector<1x128xf32>
    %20 = vector.broadcast %19 : vector<1x128xf32> to vector<8x128xf32>
    %21 = arith.addf %18, %20 : vector<8x128xf32>
    %c0_17 = arith.constant 0 : index
    %c0_18 = arith.constant 0 : index
    %22 = vector.load %arg8[%c0_17, %c0_18] : memref<8x128xf32, #tpu.memory_space<vmem>>, vector<8x128xf32>
    tpu.vector_store %arg8[%c0_17, %c0_18], %21 {strides = array<i32>} : memref<8x128xf32, #tpu.memory_space<vmem>>, vector<8x128xf32>,
    return
  }
  func.func @transform_0(%arg0: i32) -> (i32, i32) {
    %c0_i32 = arith.constant 0 : i32
    %c0_i32_0 = arith.constant 0 : i32
    return %arg0, %c0_i32 : i32, i32
  }
  func.func @transform_1(%arg0: i32) -> (i32, i32) {
    %c0_i32 = arith.constant 0 : i32
    %c0_i32_0 = arith.constant 0 : i32
    %c0_i32_1 = arith.constant 0 : i32
    return %c0_i32, %c0_i32_0 : i32, i32
  }
  func.func @transform_2(%arg0: i32) -> (i32, i32) {
    %c0_i32 = arith.constant 0 : i32
    %c0_i32_0 = arith.constant 0 : i32
    %c0_i32_1 = arith.constant 0 : i32
    return %c0_i32, %c0_i32_0 : i32, i32
  }
  func.func @transform_3(%arg0: i32) -> (i32, i32) {
    %c0_i32 = arith.constant 0 : i32
    %c0_i32_0 = arith.constant 0 : i32
    %c0_i32_1 = arith.constant 0 : i32
    return %c0_i32, %c0_i32_0 : i32, i32
  }
  func.func @transform_4(%arg0: i32) -> (i32, i32) {
    %c0_i32 = arith.constant 0 : i32
    %c0_i32_0 = arith.constant 0 : i32
    %c0_i32_1 = arith.constant 0 : i32
    return %c0_i32, %c0_i32_0 : i32, i32
  }
  func.func @transform_5(%arg0: i32) -> (i32, i32) {
    %c0_i32 = arith.constant 0 : i32
    %c0_i32_0 = arith.constant 0 : i32
    %c0_i32_1 = arith.constant 0 : i32
    return %c0_i32, %c0_i32_0 : i32, i32
  }
  func.func @transform_6(%arg0: i32) -> (i32, i32) {
    %c0_i32 = arith.constant 0 : i32
    %c0_i32_0 = arith.constant 0 : i32
    %c0_i32_1 = arith.constant 0 : i32
    return %c0_i32, %c0_i32_0 : i32, i32
  }
  func.func @transform_7(%arg0: i32) -> (i32, i32) {
    %c0_i32 = arith.constant 0 : i32
    %c0_i32_0 = arith.constant 0 : i32
    return %arg0, %c0_i32 : i32, i32
  }
}

</mosaic_0001>

<bundles_post_ra>
// kernel: neural_network23_forward.1
= control target key start
LH: loop header
LB: loop body
LE: loop exit
PB: predicated region body
PF: predicated region fallthrough
CT: control target
= control target key end

     0   :  { %vm3848_vm0 = vmmov 0   ;;  %s4984_s1 = inlined_call_operand.vmem [shape: bf16[896,512], index: 1, kind: input, shape index: {}]   ;;  %s4985_s0 = inlined_call_operand.vmem [shape: bf16[8,896], index: 0, kind: input, shape index: {}]   ;;  %s4986_s3 = inlined_call_operand.vmem [shape: bf16[512,384], index: 3, kind: input, shape index: {}]   ;;  %s4987_s2 = inlined_call_operand.vmem [shape: f32[1,512], index: 2, kind: input, shape index: {}]   ;;  %s4988_s5 = inlined_call_operand.vmem [shape: bf16[384,128], index: 5, kind: input, shape index: {}]   ;;  %s4989_s4 = inlined_call_operand.vmem [shape: f32[1,384], index: 4, kind: input, shape index: {}]   ;;  %s4990_s6 = inlined_call_operand.vmem [shape: f32[1,128], index: 6, kind: input, shape index: {}]   ;;  %s4991_s7 = inlined_call_operand.vmem [shape: f32[8,128], index: 7, kind: output, shape index: {}]  }
   0x1   :  { %v3351_v0 = vld [vmem:[%s4984_s1 + $0x4] ss:$16 sps:$4 sm:$0xff]   ;;  %v3353_v1 = vld [vmem:[%s4984_s1 + $0xc] ss:$16 sps:$4 sm:$0xff]   ;;  %v3355_v2 = vld [vmem:[%s4984_s1] ss:$16 sps:$4 sm:$0xff]  }
   0x2   :  { %1422 = vmatprep.subr.bf16.mxu0 %v3351_v0  ;;  %v3356_v3 = vld [vmem:[%s4984_s1 + $0x8] ss:$16 sps:$4 sm:$0xff]   ;;  %1586 = vmatprep.subr.bf16.mxu1 %v3353_v1  ;;  %v3357_v4 = vld [vmem:[%s4984_s1 + $0x24] ss:$16 sps:$4 sm:$0xff]   ;;  %v3359_v5 = vld [vmem:[%s4984_s1 + $0x2c] ss:$16 sps:$4 sm:$0xff]  }
   0x3   :  { %1423 = vmatpush1.bf16.msra.mxu0 %v3355_v2  ;;  %1587 = vmatpush1.bf16.msra.mxu1 %v3356_v3  ;;  %v3361_v6 = vld [vmem:[%s4984_s1 + $0x20] ss:$16 sps:$4 sm:$0xff]   ;;  %v3362_v7 = vld [vmem:[%s4984_s1 + $0x28] ss:$16 sps:$4 sm:$0xff]   ;;  %v3363_v8 = vld [vmem:[%s4984_s1 + $0x44] ss:$16 sps:$4 sm:$0xff]  }
   0x4   :  { %1424 = vmatprep.subr.bf16.mxu0 %v3357_v4  ;;  %1588 = vmatprep.subr.bf16.mxu1 %v3359_v5  ;;  %v3365_v9 = vld [vmem:[%s4984_s1 + $0x4c] ss:$16 sps:$4 sm:$0xff]   ;;  %v3367_v10 = vld [vmem:[%s4984_s1 + $0x40] ss:$16 sps:$4 sm:$0xff]   ;;  %v3368_v11 = vld [vmem:[%s4984_s1 + $0x48] ss:$16 sps:$4 sm:$0xff]  }
   0x5   :  { %v3369_v12 = vld [vmem:[%s4984_s1 + $0x64] ss:$16 sps:$4 sm:$0xff]   ;;  %v3371_v13 = vld [vmem:[%s4984_s1 + $0x6c] ss:$16 sps:$4 sm:$0xff]   ;;  %v3373_v14 = vld [vmem:[%s4984_s1 + $0x60] ss:$16 sps:$4 sm:$0xff]  }
   0x6   :  { %v3374_v15 = vld [vmem:[%s4984_s1 + $0x68] ss:$16 sps:$4 sm:$0xff]   ;;  %v3375_v16 = vld [vmem:[%s4984_s1 + $0x84] ss:$16 sps:$4 sm:$0xff]   ;;  %v3377_v17 = vld [vmem:[%s4984_s1 + $0x8c] ss:$16 sps:$4 sm:$0xff]  }
   0x7   :  { %1425 = vmatpush1.bf16.msra.mxu0 %v3361_v6  ;;  %1589 = vmatpush1.bf16.msra.mxu1 %v3362_v7  ;;  %v3379_v18 = vld [vmem:[%s4984_s1 + $0x80] ss:$16 sps:$4 sm:$0xff]   ;;  %v3380_v19 = vld [vmem:[%s4984_s1 + $0x88] ss:$16 sps:$4 sm:$0xff]   ;;  %v3381_v20 = vld [vmem:[%s4984_s1 + $0xa4] ss:$16 sps:$4 sm:$0xff]  }
   0x8   :  { %1426 = vmatprep.subr.bf16.mxu0 %v3363_v8  ;;  %1590 = vmatprep.subr.bf16.mxu1 %v3365_v9  ;;  %v3383_v21 = vld [vmem:[%s4984_s1 + $0xac] ss:$16 sps:$4 sm:$0xff]   ;;  %v3385_v22 = vld [vmem:[%s4984_s1 + $0xa0] ss:$16 sps:$4 sm:$0xff]   ;;  %v3386_v23 = vld [vmem:[%s4984_s1 + $0xa8] ss:$16 sps:$4 sm:$0xff]  }
   0x9   :  { %v3387_v24 = vld [vmem:[%s4984_s1 + $0xc4] ss:$16 sps:$4 sm:$0xff]   ;;  %v3389_v25 = vld [vmem:[%s4984_s1 + $0xcc] ss:$16 sps:$4 sm:$0xff]   ;;  %v3391_v26 = vld [vmem:[%s4984_s1 + $0xc0] ss:$16 sps:$4 sm:$0xff]  }
   0xa   :  { %v3392_v27 = vld [vmem:[%s4984_s1 + $0xc8] ss:$16 sps:$4 sm:$0xff]   ;;  %v3393_v28 = vld [vmem:[%s4984_s1 + $0xe4] ss:$16 sps:$4 sm:$0xff]   ;;  %v3395_v29 = vld [vmem:[%s4984_s1 + $0xec] ss:$16 sps:$4 sm:$0xff]  }
   0xb   :  { %1427 = vmatpush1.bf16.msra.mxu0 %v3367_v10  ;;  %1591 = vmatpush1.bf16.msra.mxu1 %v3368_v11  ;;  %v3397_v30 = vld [vmem:[%s4984_s1 + $0xe0] ss:$16 sps:$4 sm:$0xff]   ;;  %v3398_v31 = vld [vmem:[%s4984_s1 + $0xe8] ss:$16 sps:$4 sm:$0xff]   ;;  %v3399_v32 = vld [vmem:[%s4984_s1 + $0x104] ss:$16 sps:$4 sm:$0xff]  }
   0xc   :  { %1428 = vmatprep.subr.bf16.mxu0 %v3369_v12  ;;  %1592 = vmatprep.subr.bf16.mxu1 %v3371_v13  ;;  %v3401_v33 = vld [vmem:[%s4984_s1 + $0x10c] ss:$16 sps:$4 sm:$0xff]   ;;  %v3403_v34 = vld [vmem:[%s4984_s1 + $0x100] ss:$16 sps:$4 sm:$0xff]   ;;  %v3404_v35 = vld [vmem:[%s4984_s1 + $0x108] ss:$16 sps:$4 sm:$0xff]  }
   0xd   :  { %v3405_v36 = vld [vmem:[%s4984_s1 + $0x124] ss:$16 sps:$4 sm:$0xff]   ;;  %v3407_v37 = vld [vmem:[%s4984_s1 + $0x12c] ss:$16 sps:$4 sm:$0xff]   ;;  %v3409_v38 = vld [vmem:[%s4984_s1 + $0x120] ss:$16 sps:$4 sm:$0xff]  }
   0xe   :  { %v3410_v39 = vld [vmem:[%s4984_s1 + $0x128] ss:$16 sps:$4 sm:$0xff]   ;;  %v3411_v40 = vld [vmem:[%s4984_s1 + $0x144] ss:$16 sps:$4 sm:$0xff]   ;;  %v3413_v41 = vld [vmem:[%s4984_s1 + $0x14c] ss:$16 sps:$4 sm:$0xff]  }
   0xf   :  { %1429 = vmatpush1.bf16.msra.mxu0 %v3373_v14  ;;  %1593 = vmatpush1.bf16.msra.mxu1 %v3374_v15  ;;  %v3415_v42 = vld [vmem:[%s4984_s1 + $0x140] ss:$16 sps:$4 sm:$0xff]   ;;  %v3416_v43 = vld [vmem:[%s4984_s1 + $0x148] ss:$16 sps:$4 sm:$0xff]   ;;  %v3417_v44 = vld [vmem:[%s4984_s1 + $0x164] ss:$16 sps:$4 sm:$0xff]  }
  0x10   :  { %1430 = vmatprep.subr.bf16.mxu0 %v3375_v16  ;;  %1594 = vmatprep.subr.bf16.mxu1 %v3377_v17  ;;  %v3419_v45 = vld [vmem:[%s4984_s1 + $0x16c] ss:$16 sps:$4 sm:$0xff]   ;;  %v27_v46 = vld [vmem:[%s4985_s0] sm:$0xff]  ;;  %v3422_v49 = vld [vmem:[%s4984_s1 + $0x168] ss:$16 sps:$4 sm:$0xff]  }
  0x11   :  { %v3421_v47 = vld [vmem:[%s4984_s1 + $0x160] ss:$16 sps:$4 sm:$0xff]   ;;  %v2868_v48 = vcombine.high %v27_v46, %v27_v46  ;;  %v3423_v50 = vld [vmem:[%s4984_s1 + $0x184] ss:$16 sps:$4 sm:$0xff]   ;;  %v3425_v51 = vld [vmem:[%s4984_s1 + $0x18c] ss:$16 sps:$4 sm:$0xff]   ;;  %v2867_v4 = vcombine.low %v27_v46, %v27_v46 }
  0x12   :  { %v3427_v52 = vld [vmem:[%s4984_s1 + $0x180] ss:$16 sps:$4 sm:$0xff]   ;;  %v3428_v53 = vld [vmem:[%s4984_s1 + $0x188] ss:$16 sps:$4 sm:$0xff]   ;;  %v3429_v54 = vld [vmem:[%s4984_s1 + $0x1a4] ss:$16 sps:$4 sm:$0xff]  }
  0x13   :  { %1431 = vmatpush1.bf16.msra.mxu0 %v3379_v18  ;;  %1595 = vmatpush1.bf16.msra.mxu1 %v3380_v19  ;;  %v3431_v55 = vld [vmem:[%s4984_s1 + $0x1ac] ss:$16 sps:$4 sm:$0xff]   ;;  %v3433_v56 = vld [vmem:[%s4984_s1 + $0x1a0] ss:$16 sps:$4 sm:$0xff]   ;;  %v3434_v57 = vld [vmem:[%s4984_s1 + $0x1a8] ss:$16 sps:$4 sm:$0xff]  }
  0x14   :  { %1432 = vmatprep.subr.bf16.mxu0 %v3381_v20  ;;  %1596 = vmatprep.subr.bf16.mxu1 %v3383_v21  ;;  %v3435_v58 = vld [vmem:[%s4984_s1 + $0x1c4] ss:$16 sps:$4 sm:$0xff]   ;;  %v3437_v59 = vld [vmem:[%s4984_s1 + $0x1cc] ss:$16 sps:$4 sm:$0xff]   ;;  %v3439_v60 = vld [vmem:[%s4984_s1 + $0x1c0] ss:$16 sps:$4 sm:$0xff]  }
  0x15   :  { %1454 = vmatprep.mubr.bf16.mxu0 %v2868_v48  ;;  %1618 = vmatprep.mubr.bf16.mxu1 %v2868_v48  ;;  %v3440_v61 = vld [vmem:[%s4984_s1 + $0x1c8] ss:$16 sps:$4 sm:$0xff]   ;;  %v3441_v62 = vld [vmem:[%s4984_s1 + $0x1e4] ss:$16 sps:$4 sm:$0xff]   ;;  %v3443_v63 = vld [vmem:[%s4984_s1 + $0x1ec] ss:$16 sps:$4 sm:$0xff]  }
  0x16   :  { %v3445_v0 = vld [vmem:[%s4984_s1 + $0x1e0] ss:$16 sps:$4 sm:$0xff]   ;;  %v3446_v1 = vld [vmem:[%s4984_s1 + $0x1e8] ss:$16 sps:$4 sm:$0xff]   ;;  %v3451_v2 = vld [vmem:[%s4984_s1 + $0x204] ss:$16 sps:$4 sm:$0xff]  }
  0x17   :  { %1433 = vmatpush1.bf16.msra.mxu0 %v3385_v22  ;;  %1597 = vmatpush1.bf16.msra.mxu1 %v3386_v23  ;;  %v3454_v3 = vld [vmem:[%s4984_s1 + $0x20c] ss:$16 sps:$4 sm:$0xff]   ;;  %v3449_v5 = vld [vmem:[%s4984_s1 + $0x200] ss:$16 sps:$4 sm:$0xff]   ;;  %v3452_v6 = vld [vmem:[%s4984_s1 + $0x208] ss:$16 sps:$4 sm:$0xff]  }
  0x18   :  { %1434 = vmatprep.subr.bf16.mxu0 %v3387_v24  ;;  %1598 = vmatprep.subr.bf16.mxu1 %v3389_v25  ;;  %v3457_v7 = vld [vmem:[%s4984_s1 + $0x224] ss:$16 sps:$4 sm:$0xff]   ;;  %v3460_v8 = vld [vmem:[%s4984_s1 + $0x22c] ss:$16 sps:$4 sm:$0xff]   ;;  %v3455_v9 = vld [vmem:[%s4984_s1 + $0x220] ss:$16 sps:$4 sm:$0xff]  }
  0x19   :  { %v3458_v10 = vld [vmem:[%s4984_s1 + $0x228] ss:$16 sps:$4 sm:$0xff]   ;;  %v3463_v11 = vld [vmem:[%s4984_s1 + $0x244] ss:$16 sps:$4 sm:$0xff]   ;;  %v3466_v12 = vld [vmem:[%s4984_s1 + $0x24c] ss:$16 sps:$4 sm:$0xff]  }
  0x1a   :  { %v3461_v13 = vld [vmem:[%s4984_s1 + $0x240] ss:$16 sps:$4 sm:$0xff]   ;;  %v3464_v14 = vld [vmem:[%s4984_s1 + $0x248] ss:$16 sps:$4 sm:$0xff]   ;;  %v3469_v15 = vld [vmem:[%s4984_s1 + $0x264] ss:$16 sps:$4 sm:$0xff]  }
  0x1b   :  { %1435 = vmatpush1.bf16.msra.mxu0 %v3391_v26  ;;  %1599 = vmatpush1.bf16.msra.mxu1 %v3392_v27  ;;  %v3472_v16 = vld [vmem:[%s4984_s1 + $0x26c] ss:$16 sps:$4 sm:$0xff]   ;;  %v3467_v17 = vld [vmem:[%s4984_s1 + $0x260] ss:$16 sps:$4 sm:$0xff]   ;;  %v3470_v18 = vld [vmem:[%s4984_s1 + $0x268] ss:$16 sps:$4 sm:$0xff]  }
  0x1c   :  { %1436 = vmatprep.subr.bf16.mxu0 %v3393_v28  ;;  %1600 = vmatprep.subr.bf16.mxu1 %v3395_v29  ;;  %v3475_v19 = vld [vmem:[%s4984_s1 + $0x284] ss:$16 sps:$4 sm:$0xff]   ;;  %v3478_v20 = vld [vmem:[%s4984_s1 + $0x28c] ss:$16 sps:$4 sm:$0xff]   ;;  %v3473_v21 = vld [vmem:[%s4984_s1 + $0x280] ss:$16 sps:$4 sm:$0xff]  }
  0x1d   :  { %v3476_v22 = vld [vmem:[%s4984_s1 + $0x288] ss:$16 sps:$4 sm:$0xff]   ;;  %v3481_v23 = vld [vmem:[%s4984_s1 + $0x2a4] ss:$16 sps:$4 sm:$0xff]   ;;  %v3484_v24 = vld [vmem:[%s4984_s1 + $0x2ac] ss:$16 sps:$4 sm:$0xff]  }
  0x1e   :  { %v3479_v25 = vld [vmem:[%s4984_s1 + $0x2a0] ss:$16 sps:$4 sm:$0xff]   ;;  %v3482_v26 = vld [vmem:[%s4984_s1 + $0x2a8] ss:$16 sps:$4 sm:$0xff]   ;;  %v3487_v27 = vld [vmem:[%s4984_s1 + $0x2c4] ss:$16 sps:$4 sm:$0xff]  }
  0x1f   :  { %1437 = vmatpush1.bf16.msra.mxu0 %v3397_v30  ;;  %1601 = vmatpush1.bf16.msra.mxu1 %v3398_v31  ;;  %v3490_v28 = vld [vmem:[%s4984_s1 + $0x2cc] ss:$16 sps:$4 sm:$0xff]   ;;  %v3485_v31 = vld [vmem:[%s4984_s1 + $0x2c0] ss:$16 sps:$4 sm:$0xff]   ;;  %v3512_v48 = vld [vmem:[%s4984_s1 + $0x348] ss:$16 sps:$4 sm:$0xff]  }
  0x20   :  { %1438 = vmatprep.subr.bf16.mxu0 %v3399_v32  ;;  %1602 = vmatprep.subr.bf16.mxu1 %v3401_v33  ;;  %v4165_v29 = vld [vmem:[%s4985_s0 + $0x8] sm:$0xff]  ;;  %v3493_v33 = vld [vmem:[%s4984_s1 + $0x2e4] ss:$16 sps:$4 sm:$0xff]  }
  0x21   :  { %v2870_v30 = vcombine.high %v4165_v29, %v4165_v29  ;;  %v3488_v32 = vld [vmem:[%s4984_s1 + $0x2c8] ss:$16 sps:$4 sm:$0xff]   ;;  %v3514_v46 = vld [vmem:[%s4984_s1 + $0x34c] ss:$16 sps:$4 sm:$0xff]  }
  0x23   :  { %1439 = vmatpush1.bf16.msra.mxu0 %v3403_v34  ;;  %1603 = vmatpush1.bf16.msra.mxu1 %v3404_v35  ;;  %v3496_v34 = vld [vmem:[%s4984_s1 + $0x2ec] ss:$16 sps:$4 sm:$0xff]   ;;  %v3491_v35 = vld [vmem:[%s4984_s1 + $0x2e0] ss:$16 sps:$4 sm:$0xff]  }
  0x24   :  { %1440 = vmatprep.subr.bf16.mxu0 %v3405_v36  ;;  %1604 = vmatprep.subr.bf16.mxu1 %v3407_v37  ;;  %v3494_v36 = vld [vmem:[%s4984_s1 + $0x2e8] ss:$16 sps:$4 sm:$0xff]   ;;  %v3499_v37 = vld [vmem:[%s4984_s1 + $0x304] ss:$16 sps:$4 sm:$0xff]  }
  0x27   :  { %1441 = vmatpush1.bf16.msra.mxu0 %v3409_v38  ;;  %1605 = vmatpush1.bf16.msra.mxu1 %v3410_v39  ;;  %v3502_v38 = vld [vmem:[%s4984_s1 + $0x30c] ss:$16 sps:$4 sm:$0xff]   ;;  %v3497_v39 = vld [vmem:[%s4984_s1 + $0x300] ss:$16 sps:$4 sm:$0xff]  }
  0x28   :  { %1442 = vmatprep.subr.bf16.mxu0 %v3411_v40  ;;  %1606 = vmatprep.subr.bf16.mxu1 %v3413_v41  ;;  %v3500_v40 = vld [vmem:[%s4984_s1 + $0x308] ss:$16 sps:$4 sm:$0xff]   ;;  %v3505_v41 = vld [vmem:[%s4984_s1 + $0x324] ss:$16 sps:$4 sm:$0xff]  }
  0x2b   :  { %1443 = vmatpush1.bf16.msra.mxu0 %v3415_v42  ;;  %1607 = vmatpush1.bf16.msra.mxu1 %v3416_v43  ;;  %v3508_v42 = vld [vmem:[%s4984_s1 + $0x32c] ss:$16 sps:$4 sm:$0xff]   ;;  %v3503_v43 = vld [vmem:[%s4984_s1 + $0x320] ss:$16 sps:$4 sm:$0xff]  }
  0x2c   :  { %1444 = vmatprep.subr.bf16.mxu0 %v3417_v44  ;;  %1608 = vmatprep.subr.bf16.mxu1 %v3419_v45  ;;  %v3506_v44 = vld [vmem:[%s4984_s1 + $0x328] ss:$16 sps:$4 sm:$0xff]   ;;  %v3511_v45 = vld [vmem:[%s4984_s1 + $0x344] ss:$16 sps:$4 sm:$0xff]  }
  0x2f   :  { %1445 = vmatpush1.bf16.msra.mxu0 %v3421_v47  ;;  %1609 = vmatpush1.bf16.msra.mxu1 %v3422_v49  ;;  %v3509_v47 = vld [vmem:[%s4984_s1 + $0x340] ss:$16 sps:$4 sm:$0xff]   ;;  %v3517_v49 = vld [vmem:[%s4984_s1 + $0x364] ss:$16 sps:$4 sm:$0xff]  }
  0x30   :  { %1446 = vmatprep.subr.bf16.mxu0 %v3423_v50  ;;  %1610 = vmatprep.subr.bf16.mxu1 %v3425_v51  ;;  %v3520_v50 = vld [vmem:[%s4984_s1 + $0x36c] ss:$16 sps:$4 sm:$0xff]   ;;  %v3515_v51 = vld [vmem:[%s4984_s1 + $0x360] ss:$16 sps:$4 sm:$0xff]  }
  0x33   :  { %1447 = vmatpush1.bf16.msra.mxu0 %v3427_v52  ;;  %1611 = vmatpush1.bf16.msra.mxu1 %v3428_v53  ;;  %v3518_v52 = vld [vmem:[%s4984_s1 + $0x368] ss:$16 sps:$4 sm:$0xff]   ;;  %v3523_v53 = vld [vmem:[%s4984_s1 + $0x384] ss:$16 sps:$4 sm:$0xff]  }
  0x34   :  { %1448 = vmatprep.subr.bf16.mxu0 %v3429_v54  ;;  %1612 = vmatprep.subr.bf16.mxu1 %v3431_v55  ;;  %v3526_v54 = vld [vmem:[%s4984_s1 + $0x38c] ss:$16 sps:$4 sm:$0xff]   ;;  %v3521_v55 = vld [vmem:[%s4984_s1 + $0x380] ss:$16 sps:$4 sm:$0xff]  }
  0x37   :  { %1449 = vmatpush1.bf16.msra.mxu0 %v3433_v56  ;;  %1613 = vmatpush1.bf16.msra.mxu1 %v3434_v57  ;;  %v3524_v56 = vld [vmem:[%s4984_s1 + $0x388] ss:$16 sps:$4 sm:$0xff]   ;;  %v3529_v57 = vld [vmem:[%s4984_s1 + $0x3a4] ss:$16 sps:$4 sm:$0xff]  }
  0x38   :  { %1450 = vmatprep.subr.bf16.mxu0 %v3435_v58  ;;  %1614 = vmatprep.subr.bf16.mxu1 %v3437_v59  ;;  %v3532_v58 = vld [vmem:[%s4984_s1 + $0x3ac] ss:$16 sps:$4 sm:$0xff]   ;;  %v3527_v59 = vld [vmem:[%s4984_s1 + $0x3a0] ss:$16 sps:$4 sm:$0xff]  }
  0x3b   :  { %1451 = vmatpush1.bf16.msra.mxu0 %v3439_v60  ;;  %1615 = vmatpush1.bf16.msra.mxu1 %v3440_v61  ;;  %v3530_v60 = vld [vmem:[%s4984_s1 + $0x3a8] ss:$16 sps:$4 sm:$0xff]   ;;  %v3535_v61 = vld [vmem:[%s4984_s1 + $0x3c4] ss:$16 sps:$4 sm:$0xff]  }
  0x3c   :  { %1452 = vmatprep.subr.bf16.mxu0 %v3441_v62  ;;  %1616 = vmatprep.subr.bf16.mxu1 %v3443_v63  ;;  %v3538_v62 = vld [vmem:[%s4984_s1 + $0x3cc] ss:$16 sps:$4 sm:$0xff]   ;;  %v3533_v63 = vld [vmem:[%s4984_s1 + $0x3c0] ss:$16 sps:$4 sm:$0xff]  }
  0x3f   :  { %1453 = vmatpush1.bf16.msra.mxu0 %v3445_v0  ;;  %1617 = vmatpush1.bf16.msra.mxu1 %v3446_v1  ;;  %v3536_v0 = vld [vmem:[%s4984_s1 + $0x3c8] ss:$16 sps:$4 sm:$0xff]   ;;  %v3541_v1 = vld [vmem:[%s4984_s1 + $0x3e4] ss:$16 sps:$4 sm:$0xff]  }
  0x40   :  { %1463 = vmatprep.subr.bf16.mxu0 %v3451_v2  ;;  %1627 = vmatprep.subr.bf16.mxu1 %v3454_v3  ;;  %v3544_v2 = vld [vmem:[%s4984_s1 + $0x3ec] ss:$16 sps:$4 sm:$0xff]   ;;  %v3539_v3 = vld [vmem:[%s4984_s1 + $0x3e0] ss:$16 sps:$4 sm:$0xff]  }
  0x42   :  { %1455 = vmatmul.mubr.bf16.vlgmr.msra.gmra.mrb[0].mxu0 %v2867_v4  ;;  %1619 = vmatmul.mubr.bf16.vlgmr.msra.gmra.mrb[0].mxu1 %v2867_v4  ;;  %v3542_v4 = vld [vmem:[%s4984_s1 + $0x3e8] ss:$16 sps:$4 sm:$0xff]  }
  0x43   :  { %1464 = vmatpush1.bf16.msra.mxu0 %v3449_v5  ;;  %1628 = vmatpush1.bf16.msra.mxu1 %v3452_v6  ;;  %v3549_v5 = vld [vmem:[%s4984_s1 + $0x404] ss:$16 sps:$4 sm:$0xff]   ;;  %v3552_v6 = vld [vmem:[%s4984_s1 + $0x40c] ss:$16 sps:$4 sm:$0xff]  }
  0x44   :  { %1465 = vmatprep.subr.bf16.mxu0 %v3457_v7  ;;  %1629 = vmatprep.subr.bf16.mxu1 %v3460_v8  ;;  %v2869_v7 = vcombine.low %v4165_v29, %v4165_v29  ;;  %v3547_v8 = vld [vmem:[%s4984_s1 + $0x400] ss:$16 sps:$4 sm:$0xff]   ;;  %v3582_v29 = vld [vmem:[%s4984_s1 + $0x4ac] ss:$16 sps:$4 sm:$0xff]  }
  0x45   :  { %1495 = vmatprep.mubr.bf16.mxu0 %v2870_v30  ;;  %1659 = vmatprep.mubr.bf16.mxu1 %v2870_v30  ;;  %v3577_v30 = vld [vmem:[%s4984_s1 + $0x4a0] ss:$16 sps:$4 sm:$0xff]  }
  0x47   :  { %1466 = vmatpush1.bf16.msra.mxu0 %v3455_v9  ;;  %1630 = vmatpush1.bf16.msra.mxu1 %v3458_v10  ;;  %v3550_v9 = vld [vmem:[%s4984_s1 + $0x408] ss:$16 sps:$4 sm:$0xff]   ;;  %v3555_v10 = vld [vmem:[%s4984_s1 + $0x424] ss:$16 sps:$4 sm:$0xff]  }
  0x48   :  { %1467 = vmatprep.subr.bf16.mxu0 %v3463_v11  ;;  %1631 = vmatprep.subr.bf16.mxu1 %v3466_v12  ;;  %v4303_v11 = vld [vmem:[%s4985_s0 + $0x10] sm:$0xff]  ;;  %v3558_v12 = vld [vmem:[%s4984_s1 + $0x42c] ss:$16 sps:$4 sm:$0xff]  }
  0x4b   :  { %1468 = vmatpush1.bf16.msra.mxu0 %v3461_v13  ;;  %1632 = vmatpush1.bf16.msra.mxu1 %v3464_v14  ;;  %v2872_v13 = vcombine.high %v4303_v11, %v4303_v11  ;;  %v3553_v14 = vld [vmem:[%s4984_s1 + $0x420] ss:$16 sps:$4 sm:$0xff]  }
  0x4c   :  { %1469 = vmatprep.subr.bf16.mxu0 %v3469_v15  ;;  %1633 = vmatprep.subr.bf16.mxu1 %v3472_v16  ;;  %v3556_v15 = vld [vmem:[%s4984_s1 + $0x428] ss:$16 sps:$4 sm:$0xff]   ;;  %v3561_v16 = vld [vmem:[%s4984_s1 + $0x444] ss:$16 sps:$4 sm:$0xff]  }
  0x4f   :  { %1470 = vmatpush1.bf16.msra.mxu0 %v3467_v17  ;;  %1634 = vmatpush1.bf16.msra.mxu1 %v3470_v18  ;;  %v3564_v17 = vld [vmem:[%s4984_s1 + $0x44c] ss:$16 sps:$4 sm:$0xff]   ;;  %v3559_v18 = vld [vmem:[%s4984_s1 + $0x440] ss:$16 sps:$4 sm:$0xff]  }
  0x50   :  { %1471 = vmatprep.subr.bf16.mxu0 %v3475_v19  ;;  %1635 = vmatprep.subr.bf16.mxu1 %v3478_v20  ;;  %v3562_v19 = vld [vmem:[%s4984_s1 + $0x448] ss:$16 sps:$4 sm:$0xff]   ;;  %v3567_v20 = vld [vmem:[%s4984_s1 + $0x464] ss:$16 sps:$4 sm:$0xff]  }
  0x53   :  { %1472 = vmatpush1.bf16.msra.mxu0 %v3473_v21  ;;  %1636 = vmatpush1.bf16.msra.mxu1 %v3476_v22  ;;  %v3570_v21 = vld [vmem:[%s4984_s1 + $0x46c] ss:$16 sps:$4 sm:$0xff]   ;;  %v3565_v22 = vld [vmem:[%s4984_s1 + $0x460] ss:$16 sps:$4 sm:$0xff]  }
  0x54   :  { %1473 = vmatprep.subr.bf16.mxu0 %v3481_v23  ;;  %1637 = vmatprep.subr.bf16.mxu1 %v3484_v24  ;;  %v3568_v23 = vld [vmem:[%s4984_s1 + $0x468] ss:$16 sps:$4 sm:$0xff]   ;;  %v3573_v24 = vld [vmem:[%s4984_s1 + $0x484] ss:$16 sps:$4 sm:$0xff]  }
  0x57   :  { %1474 = vmatpush1.bf16.msra.mxu0 %v3479_v25  ;;  %1638 = vmatpush1.bf16.msra.mxu1 %v3482_v26  ;;  %v3576_v25 = vld [vmem:[%s4984_s1 + $0x48c] ss:$16 sps:$4 sm:$0xff]   ;;  %v3571_v26 = vld [vmem:[%s4984_s1 + $0x480] ss:$16 sps:$4 sm:$0xff]  }
  0x58   :  { %1475 = vmatprep.subr.bf16.mxu0 %v3487_v27  ;;  %1639 = vmatprep.subr.bf16.mxu1 %v3490_v28  ;;  %v3574_v27 = vld [vmem:[%s4984_s1 + $0x488] ss:$16 sps:$4 sm:$0xff]   ;;  %v3579_v28 = vld [vmem:[%s4984_s1 + $0x4a4] ss:$16 sps:$4 sm:$0xff]  }
  0x5b   :  { %1476 = vmatpush1.bf16.msra.mxu0 %v3485_v31  ;;  %1640 = vmatpush1.bf16.msra.mxu1 %v3488_v32  ;;  %v3580_v31 = vld [vmem:[%s4984_s1 + $0x4a8] ss:$16 sps:$4 sm:$0xff]   ;;  %v3585_v32 = vld [vmem:[%s4984_s1 + $0x4c4] ss:$16 sps:$4 sm:$0xff]  }
  0x5c   :  { %1477 = vmatprep.subr.bf16.mxu0 %v3493_v33  ;;  %1641 = vmatprep.subr.bf16.mxu1 %v3496_v34  ;;  %v3588_v33 = vld [vmem:[%s4984_s1 + $0x4cc] ss:$16 sps:$4 sm:$0xff]   ;;  %v3583_v34 = vld [vmem:[%s4984_s1 + $0x4c0] ss:$16 sps:$4 sm:$0xff]  }
  0x5f   :  { %1478 = vmatpush1.bf16.msra.mxu0 %v3491_v35  ;;  %1642 = vmatpush1.bf16.msra.mxu1 %v3494_v36  ;;  %v3586_v35 = vld [vmem:[%s4984_s1 + $0x4c8] ss:$16 sps:$4 sm:$0xff]   ;;  %v3591_v36 = vld [vmem:[%s4984_s1 + $0x4e4] ss:$16 sps:$4 sm:$0xff]  }
  0x60   :  { %1479 = vmatprep.subr.bf16.mxu0 %v3499_v37  ;;  %1643 = vmatprep.subr.bf16.mxu1 %v3502_v38  ;;  %v3594_v37 = vld [vmem:[%s4984_s1 + $0x4ec] ss:$16 sps:$4 sm:$0xff]   ;;  %v3589_v38 = vld [vmem:[%s4984_s1 + $0x4e0] ss:$16 sps:$4 sm:$0xff]  }
  0x63   :  { %1480 = vmatpush1.bf16.msra.mxu0 %v3497_v39  ;;  %1644 = vmatpush1.bf16.msra.mxu1 %v3500_v40  ;;  %v3592_v39 = vld [vmem:[%s4984_s1 + $0x4e8] ss:$16 sps:$4 sm:$0xff]   ;;  %v3597_v40 = vld [vmem:[%s4984_s1 + $0x504] ss:$16 sps:$4 sm:$0xff]  }
  0x64   :  { %1481 = vmatprep.subr.bf16.mxu0 %v3505_v41  ;;  %1645 = vmatprep.subr.bf16.mxu1 %v3508_v42  ;;  %v3600_v41 = vld [vmem:[%s4984_s1 + $0x50c] ss:$16 sps:$4 sm:$0xff]   ;;  %v3595_v42 = vld [vmem:[%s4984_s1 + $0x500] ss:$16 sps:$4 sm:$0xff]  }
  0x67   :  { %1482 = vmatpush1.bf16.msra.mxu0 %v3503_v43  ;;  %1646 = vmatpush1.bf16.msra.mxu1 %v3506_v44  ;;  %v3598_v43 = vld [vmem:[%s4984_s1 + $0x508] ss:$16 sps:$4 sm:$0xff]   ;;  %v3603_v44 = vld [vmem:[%s4984_s1 + $0x524] ss:$16 sps:$4 sm:$0xff]  }
  0x68   :  { %1483 = vmatprep.subr.bf16.mxu0 %v3511_v45  ;;  %1647 = vmatprep.subr.bf16.mxu1 %v3514_v46  ;;  %v3606_v45 = vld [vmem:[%s4984_s1 + $0x52c] ss:$16 sps:$4 sm:$0xff]   ;;  %v3601_v46 = vld [vmem:[%s4984_s1 + $0x520] ss:$16 sps:$4 sm:$0xff]  }
  0x6b   :  { %1484 = vmatpush1.bf16.msra.mxu0 %v3509_v47  ;;  %1648 = vmatpush1.bf16.msra.mxu1 %v3512_v48  ;;  %v3604_v47 = vld [vmem:[%s4984_s1 + $0x528] ss:$16 sps:$4 sm:$0xff]   ;;  %v3609_v48 = vld [vmem:[%s4984_s1 + $0x544] ss:$16 sps:$4 sm:$0xff]  }
  0x6c   :  { %1485 = vmatprep.subr.bf16.mxu0 %v3517_v49  ;;  %1649 = vmatprep.subr.bf16.mxu1 %v3520_v50  ;;  %v3612_v49 = vld [vmem:[%s4984_s1 + $0x54c] ss:$16 sps:$4 sm:$0xff]   ;;  %v3607_v50 = vld [vmem:[%s4984_s1 + $0x540] ss:$16 sps:$4 sm:$0xff]  }
  0x6f   :  { %1486 = vmatpush1.bf16.msra.mxu0 %v3515_v51  ;;  %1650 = vmatpush1.bf16.msra.mxu1 %v3518_v52  ;;  %v3610_v51 = vld [vmem:[%s4984_s1 + $0x548] ss:$16 sps:$4 sm:$0xff]   ;;  %v3615_v52 = vld [vmem:[%s4984_s1 + $0x564] ss:$16 sps:$4 sm:$0xff]  }
  0x70   :  { %1487 = vmatprep.subr.bf16.mxu0 %v3523_v53  ;;  %1651 = vmatprep.subr.bf16.mxu1 %v3526_v54  ;;  %v3618_v53 = vld [vmem:[%s4984_s1 + $0x56c] ss:$16 sps:$4 sm:$0xff]   ;;  %v3613_v54 = vld [vmem:[%s4984_s1 + $0x560] ss:$16 sps:$4 sm:$0xff]  }
  0x73   :  { %1488 = vmatpush1.bf16.msra.mxu0 %v3521_v55  ;;  %1652 = vmatpush1.bf16.msra.mxu1 %v3524_v56  ;;  %v3616_v55 = vld [vmem:[%s4984_s1 + $0x568] ss:$16 sps:$4 sm:$0xff]   ;;  %v3621_v56 = vld [vmem:[%s4984_s1 + $0x584] ss:$16 sps:$4 sm:$0xff]  }
  0x74   :  { %1489 = vmatprep.subr.bf16.mxu0 %v3529_v57  ;;  %1653 = vmatprep.subr.bf16.mxu1 %v3532_v58  ;;  %v3624_v57 = vld [vmem:[%s4984_s1 + $0x58c] ss:$16 sps:$4 sm:$0xff]   ;;  %v3619_v58 = vld [vmem:[%s4984_s1 + $0x580] ss:$16 sps:$4 sm:$0xff]  }
  0x77   :  { %1490 = vmatpush1.bf16.msra.mxu0 %v3527_v59  ;;  %1654 = vmatpush1.bf16.msra.mxu1 %v3530_v60  ;;  %v3622_v59 = vld [vmem:[%s4984_s1 + $0x588] ss:$16 sps:$4 sm:$0xff]   ;;  %v3627_v60 = vld [vmem:[%s4984_s1 + $0x5a4] ss:$16 sps:$4 sm:$0xff]  }
  0x78   :  { %1491 = vmatprep.subr.bf16.mxu0 %v3535_v61  ;;  %1655 = vmatprep.subr.bf16.mxu1 %v3538_v62  ;;  %v3630_v61 = vld [vmem:[%s4984_s1 + $0x5ac] ss:$16 sps:$4 sm:$0xff]   ;;  %v3625_v62 = vld [vmem:[%s4984_s1 + $0x5a0] ss:$16 sps:$4 sm:$0xff]  }
  0x7b   :  { %1492 = vmatpush1.bf16.msra.mxu0 %v3533_v63  ;;  %1656 = vmatpush1.bf16.msra.mxu1 %v3536_v0  ;;  %v3628_v63 = vld [vmem:[%s4984_s1 + $0x5a8] ss:$16 sps:$4 sm:$0xff]   ;;  %v3633_v0 = vld [vmem:[%s4984_s1 + $0x5c4] ss:$16 sps:$4 sm:$0xff]  }
  0x7c   :  { %1493 = vmatprep.subr.bf16.mxu0 %v3541_v1  ;;  %1657 = vmatprep.subr.bf16.mxu1 %v3544_v2  ;;  %v3636_v1 = vld [vmem:[%s4984_s1 + $0x5cc] ss:$16 sps:$4 sm:$0xff]   ;;  %v3631_v2 = vld [vmem:[%s4984_s1 + $0x5c0] ss:$16 sps:$4 sm:$0xff]  }
  0x7f   :  { %1494 = vmatpush1.bf16.msra.mxu0 %v3539_v3  ;;  %1658 = vmatpush1.bf16.msra.mxu1 %v3542_v4  ;;  %v3634_v3 = vld [vmem:[%s4984_s1 + $0x5c8] ss:$16 sps:$4 sm:$0xff]   ;;  %v3639_v4 = vld [vmem:[%s4984_s1 + $0x5e4] ss:$16 sps:$4 sm:$0xff]  }
  0x80   :  { %1504 = vmatprep.subr.bf16.mxu0 %v3549_v5  ;;  %1668 = vmatprep.subr.bf16.mxu1 %v3552_v6  ;;  %v3642_v5 = vld [vmem:[%s4984_s1 + $0x5ec] ss:$16 sps:$4 sm:$0xff]   ;;  %v3637_v6 = vld [vmem:[%s4984_s1 + $0x5e0] ss:$16 sps:$4 sm:$0xff]  }
  0x82   :  { %1496 = vmatmul.mubr.bf16.vlgmr.msra.gmra.mrb[0].mxu0 %v2869_v7  ;;  %1660 = vmatmul.mubr.bf16.vlgmr.msra.gmra.mrb[0].mxu1 %v2869_v7  ;;  %v3640_v7 = vld [vmem:[%s4984_s1 + $0x5e8] ss:$16 sps:$4 sm:$0xff]  }
  0x83   :  { %1505 = vmatpush1.bf16.msra.mxu0 %v3547_v8  ;;  %1669 = vmatpush1.bf16.msra.mxu1 %v3550_v9  ;;  %v3647_v8 = vld [vmem:[%s4984_s1 + $0x604] ss:$16 sps:$4 sm:$0xff]   ;;  %v3650_v9 = vld [vmem:[%s4984_s1 + $0x60c] ss:$16 sps:$4 sm:$0xff]  }
  0x84   :  { %1506 = vmatprep.subr.bf16.mxu0 %v3555_v10  ;;  %1670 = vmatprep.subr.bf16.mxu1 %v3558_v12  ;;  %v3645_v10 = vld [vmem:[%s4984_s1 + $0x600] ss:$16 sps:$4 sm:$0xff]   ;;  %v3648_v12 = vld [vmem:[%s4984_s1 + $0x608] ss:$16 sps:$4 sm:$0xff]  }
  0x85   :  { %1536 = vmatprep.mubr.bf16.mxu0 %v2872_v13  ;;  %1700 = vmatprep.mubr.bf16.mxu1 %v2872_v13  ;;  %v2871_v13 = vcombine.low %v4303_v11, %v4303_v11  ;;  %v3654_v11 = vld [vmem:[%s4984_s1 + $0x628] ss:$16 sps:$4 sm:$0xff]  }
  0x87   :  { %1507 = vmatpush1.bf16.msra.mxu0 %v3553_v14  ;;  %1671 = vmatpush1.bf16.msra.mxu1 %v3556_v15  ;;  %v3653_v14 = vld [vmem:[%s4984_s1 + $0x624] ss:$16 sps:$4 sm:$0xff]   ;;  %v3656_v15 = vld [vmem:[%s4984_s1 + $0x62c] ss:$16 sps:$4 sm:$0xff]  }
  0x88   :  { %1508 = vmatprep.subr.bf16.mxu0 %v3561_v16  ;;  %1672 = vmatprep.subr.bf16.mxu1 %v3564_v17  ;;  %v3651_v16 = vld [vmem:[%s4984_s1 + $0x620] ss:$16 sps:$4 sm:$0xff]   ;;  %v3659_v17 = vld [vmem:[%s4984_s1 + $0x644] ss:$16 sps:$4 sm:$0xff]  }
  0x8b   :  { %1509 = vmatpush1.bf16.msra.mxu0 %v3559_v18  ;;  %1673 = vmatpush1.bf16.msra.mxu1 %v3562_v19  ;;  %v3662_v18 = vld [vmem:[%s4984_s1 + $0x64c] ss:$16 sps:$4 sm:$0xff]   ;;  %v3657_v19 = vld [vmem:[%s4984_s1 + $0x640] ss:$16 sps:$4 sm:$0xff]  }
  0x8c   :  { %1510 = vmatprep.subr.bf16.mxu0 %v3567_v20  ;;  %1674 = vmatprep.subr.bf16.mxu1 %v3570_v21  ;;  %v3660_v20 = vld [vmem:[%s4984_s1 + $0x648] ss:$16 sps:$4 sm:$0xff]   ;;  %v3846_v21 = vmov 0  }
  0x8f   :  { %1511 = vmatpush1.bf16.msra.mxu0 %v3565_v22  ;;  %1675 = vmatpush1.bf16.msra.mxu1 %v3568_v23  ;;  %v3665_v22 = vld [vmem:[%s4984_s1 + $0x664] ss:$16 sps:$4 sm:$0xff]   ;;  %v3668_v23 = vld [vmem:[%s4984_s1 + $0x66c] ss:$16 sps:$4 sm:$0xff]  }
  0x90   :  { %1512 = vmatprep.subr.bf16.mxu0 %v3573_v24  ;;  %1676 = vmatprep.subr.bf16.mxu1 %v3576_v25  ;;  %v3663_v24 = vld [vmem:[%s4984_s1 + $0x660] ss:$16 sps:$4 sm:$0xff]   ;;  %v3666_v25 = vld [vmem:[%s4984_s1 + $0x668] ss:$16 sps:$4 sm:$0xff]  }
  0x93   :  { %1513 = vmatpush1.bf16.msra.mxu0 %v3571_v26  ;;  %1677 = vmatpush1.bf16.msra.mxu1 %v3574_v27  ;;  %v3671_v26 = vld [vmem:[%s4984_s1 + $0x684] ss:$16 sps:$4 sm:$0xff]   ;;  %v3674_v27 = vld [vmem:[%s4984_s1 + $0x68c] ss:$16 sps:$4 sm:$0xff]  }
  0x94   :  { %1514 = vmatprep.subr.bf16.mxu0 %v3579_v28  ;;  %1678 = vmatprep.subr.bf16.mxu1 %v3582_v29  ;;  %v3669_v28 = vld [vmem:[%s4984_s1 + $0x680] ss:$16 sps:$4 sm:$0xff]   ;;  %v3672_v29 = vld [vmem:[%s4984_s1 + $0x688] ss:$16 sps:$4 sm:$0xff]  }
  0x97   :  { %1515 = vmatpush1.bf16.msra.mxu0 %v3577_v30  ;;  %1679 = vmatpush1.bf16.msra.mxu1 %v3580_v31  ;;  %v3677_v30 = vld [vmem:[%s4984_s1 + $0x6a4] ss:$16 sps:$4 sm:$0xff]   ;;  %v3680_v31 = vld [vmem:[%s4984_s1 + $0x6ac] ss:$16 sps:$4 sm:$0xff]  }
  0x98   :  { %1516 = vmatprep.subr.bf16.mxu0 %v3585_v32  ;;  %1680 = vmatprep.subr.bf16.mxu1 %v3588_v33  ;;  %v3675_v32 = vld [vmem:[%s4984_s1 + $0x6a0] ss:$16 sps:$4 sm:$0xff]   ;;  %v3678_v33 = vld [vmem:[%s4984_s1 + $0x6a8] ss:$16 sps:$4 sm:$0xff]  }
  0x9b   :  { %1517 = vmatpush1.bf16.msra.mxu0 %v3583_v34  ;;  %1681 = vmatpush1.bf16.msra.mxu1 %v3586_v35  ;;  %v3683_v34 = vld [vmem:[%s4984_s1 + $0x6c4] ss:$16 sps:$4 sm:$0xff]   ;;  %v3686_v35 = vld [vmem:[%s4984_s1 + $0x6cc] ss:$16 sps:$4 sm:$0xff]  }
  0x9c   :  { %1518 = vmatprep.subr.bf16.mxu0 %v3591_v36  ;;  %1682 = vmatprep.subr.bf16.mxu1 %v3594_v37  ;;  %v3681_v36 = vld [vmem:[%s4984_s1 + $0x6c0] ss:$16 sps:$4 sm:$0xff]   ;;  %v3684_v37 = vld [vmem:[%s4984_s1 + $0x6c8] ss:$16 sps:$4 sm:$0xff]  }
  0x9f   :  { %1519 = vmatpush1.bf16.msra.mxu0 %v3589_v38  ;;  %1683 = vmatpush1.bf16.msra.mxu1 %v3592_v39  ;;  %v3689_v38 = vld [vmem:[%s4984_s1 + $0x6e4] ss:$16 sps:$4 sm:$0xff]   ;;  %v3692_v39 = vld [vmem:[%s4984_s1 + $0x6ec] ss:$16 sps:$4 sm:$0xff]  }
  0xa0   :  { %1520 = vmatprep.subr.bf16.mxu0 %v3597_v40  ;;  %1684 = vmatprep.subr.bf16.mxu1 %v3600_v41  ;;  %v3687_v40 = vld [vmem:[%s4984_s1 + $0x6e0] ss:$16 sps:$4 sm:$0xff]   ;;  %v3690_v41 = vld [vmem:[%s4984_s1 + $0x6e8] ss:$16 sps:$4 sm:$0xff]  }
  0xa3   :  { %1521 = vmatpush1.bf16.msra.mxu0 %v3595_v42  ;;  %1685 = vmatpush1.bf16.msra.mxu1 %v3598_v43  ;;  %v3696_v42 = vld [vmem:[%s4986_s3 + $0x4] ss:$12 sps:$4 sm:$0xff]   ;;  %v3721_v43 = vld [vmem:[%s4986_s3 + $0xc8] ss:$12 sps:$4 sm:$0xff]  }
  0xa4   :  { %1522 = vmatprep.subr.bf16.mxu0 %v3603_v44  ;;  %1686 = vmatprep.subr.bf16.mxu1 %v3606_v45  ;;  %v3693_v44 = vld [vmem:[%s4985_s0 + $0x18] ss:$0 sps:$4 sm:$0xff]   ;;  %v3694_v45 = vld [vmem:[%s4986_s3] ss:$12 sps:$4 sm:$0xff]  }
  0xa7   :  { %1523 = vmatpush1.bf16.msra.mxu0 %v3601_v46  ;;  %1687 = vmatpush1.bf16.msra.mxu1 %v3604_v47  ;;  %v3722_v46 = vld [vmem:[%s4986_s3 + $0x8] ss:$12 sps:$4 sm:$0xff]  }
  0xa8   :  { %1524 = vmatprep.subr.bf16.mxu0 %v3609_v48  ;;  %1688 = vmatprep.subr.bf16.mxu1 %v3612_v49  ;;  %v3699_v47 = vld [vmem:[%s4986_s3 + $0x1c] ss:$12 sps:$4 sm:$0xff]   ;;  %v3726_v48 = vld [vmem:[%s4986_s3 + $0xe0] ss:$12 sps:$4 sm:$0xff]   ;;  %v3697_v49 = vld [vmem:[%s4986_s3 + $0x18] ss:$12 sps:$4 sm:$0xff]  }
  0xab   :  { %1525 = vmatpush1.bf16.msra.mxu0 %v3607_v50  ;;  %1689 = vmatpush1.bf16.msra.mxu1 %v3610_v51  ;;  %v3727_v50 = vld [vmem:[%s4986_s3 + $0x20] ss:$12 sps:$4 sm:$0xff]  }
  0xac   :  { %1526 = vmatprep.subr.bf16.mxu0 %v3615_v52  ;;  %1690 = vmatprep.subr.bf16.mxu1 %v3618_v53  ;;  %v3702_v51 = vld [vmem:[%s4986_s3 + $0x34] ss:$12 sps:$4 sm:$0xff]   ;;  %v3731_v52 = vld [vmem:[%s4986_s3 + $0xf8] ss:$12 sps:$4 sm:$0xff]   ;;  %v3700_v53 = vld [vmem:[%s4986_s3 + $0x30] ss:$12 sps:$4 sm:$0xff]  }
  0xaf   :  { %1527 = vmatpush1.bf16.msra.mxu0 %v3613_v54  ;;  %1691 = vmatpush1.bf16.msra.mxu1 %v3616_v55  ;;  %v3732_v54 = vld [vmem:[%s4986_s3 + $0x38] ss:$12 sps:$4 sm:$0xff]  }
  0xb0   :  { %1528 = vmatprep.subr.bf16.mxu0 %v3621_v56  ;;  %1692 = vmatprep.subr.bf16.mxu1 %v3624_v57  ;;  %v3705_v55 = vld [vmem:[%s4986_s3 + $0x4c] ss:$12 sps:$4 sm:$0xff]   ;;  %v3736_v56 = vld [vmem:[%s4986_s3 + $0x110] ss:$12 sps:$4 sm:$0xff]   ;;  %v3703_v57 = vld [vmem:[%s4986_s3 + $0x48] ss:$12 sps:$4 sm:$0xff]  }
  0xb3   :  { %1529 = vmatpush1.bf16.msra.mxu0 %v3619_v58  ;;  %1693 = vmatpush1.bf16.msra.mxu1 %v3622_v59  ;;  %v3737_v58 = vld [vmem:[%s4986_s3 + $0x50] ss:$12 sps:$4 sm:$0xff]  }
  0xb4   :  { %1530 = vmatprep.subr.bf16.mxu0 %v3627_v60  ;;  %1694 = vmatprep.subr.bf16.mxu1 %v3630_v61  ;;  %v3708_v59 = vld [vmem:[%s4986_s3 + $0x64] ss:$12 sps:$4 sm:$0xff]   ;;  %v3741_v60 = vld [vmem:[%s4986_s3 + $0x128] ss:$12 sps:$4 sm:$0xff]   ;;  %v3706_v61 = vld [vmem:[%s4986_s3 + $0x60] ss:$12 sps:$4 sm:$0xff]  }
  0xb7   :  { %1531 = vmatpush1.bf16.msra.mxu0 %v3625_v62  ;;  %1695 = vmatpush1.bf16.msra.mxu1 %v3628_v63  ;;  %v3742_v62 = vld [vmem:[%s4986_s3 + $0x68] ss:$12 sps:$4 sm:$0xff]  }
  0xb8   :  { %1532 = vmatprep.subr.bf16.mxu0 %v3633_v0  ;;  %1696 = vmatprep.subr.bf16.mxu1 %v3636_v1  ;;  %v3711_v63 = vld [vmem:[%s4986_s3 + $0x7c] ss:$12 sps:$4 sm:$0xff]   ;;  %v3746_v0 = vld [vmem:[%s4986_s3 + $0x140] ss:$12 sps:$4 sm:$0xff]   ;;  %v3709_v1 = vld [vmem:[%s4986_s3 + $0x78] ss:$12 sps:$4 sm:$0xff]  }
  0xbb   :  { %1533 = vmatpush1.bf16.msra.mxu0 %v3631_v2  ;;  %1697 = vmatpush1.bf16.msra.mxu1 %v3634_v3  ;;  %v3747_v2 = vld [vmem:[%s4986_s3 + $0x80] ss:$12 sps:$4 sm:$0xff]  }
  0xbc   :  { %1534 = vmatprep.subr.bf16.mxu0 %v3639_v4  ;;  %1698 = vmatprep.subr.bf16.mxu1 %v3642_v5  ;;  %v3714_v3 = vld [vmem:[%s4986_s3 + $0x94] ss:$12 sps:$4 sm:$0xff]   ;;  %v3712_v4 = vld [vmem:[%s4986_s3 + $0x90] ss:$12 sps:$4 sm:$0xff]   ;;  %v3717_v5 = vld [vmem:[%s4986_s3 + $0xac] ss:$12 sps:$4 sm:$0xff]  }
  0xbf   :  { %1535 = vmatpush1.bf16.msra.mxu0 %v3637_v6  ;;  %1699 = vmatpush1.bf16.msra.mxu1 %v3640_v7  ;;  %v3715_v6 = vld [vmem:[%s4986_s3 + $0xa8] ss:$12 sps:$4 sm:$0xff]   ;;  %v3720_v7 = vld [vmem:[%s4986_s3 + $0xc4] ss:$12 sps:$4 sm:$0xff]  }
  0xc0   :  { %1545 = vmatprep.subr.bf16.mxu0 %v3647_v8  ;;  %1709 = vmatprep.subr.bf16.mxu1 %v3650_v9  ;;  %v3718_v8 = vld [vmem:[%s4986_s3 + $0xc0] ss:$12 sps:$4 sm:$0xff]   ;;  %v3725_v9 = vld [vmem:[%s4986_s3 + $0xdc] ss:$12 sps:$4 sm:$0xff]  }
  0xc2   :  { %1537 = vmatmul.mubr.bf16.vlgmr.msra.gmra.mrb[0].mxu0 %v2871_v13  ;;  %1701 = vmatmul.mubr.bf16.vlgmr.msra.gmra.mrb[0].mxu1 %v2871_v13  ;;  %v3728_v13 = vld [vmem:[%s4986_s3 + $0xf0] ss:$12 sps:$4 sm:$0xff]  }
  0xc3   :  { %1546 = vmatpush1.bf16.msra.mxu0 %v3645_v10  ;;  %1710 = vmatpush1.bf16.msra.mxu1 %v3648_v12  ;;  %v3723_v10 = vld [vmem:[%s4986_s3 + $0xd8] ss:$12 sps:$4 sm:$0xff]   ;;  %v3730_v12 = vld [vmem:[%s4986_s3 + $0xf4] ss:$12 sps:$4 sm:$0xff]  }
  0xc4   :  { %1547 = vmatprep.subr.bf16.mxu0 %v3653_v14  ;;  %1711 = vmatprep.subr.bf16.mxu1 %v3656_v15  ;;  %v3735_v14 = vld [vmem:[%s4986_s3 + $0x10c] ss:$12 sps:$4 sm:$0xff]   ;;  %v3733_v15 = vld [vmem:[%s4986_s3 + $0x108] ss:$12 sps:$4 sm:$0xff]  }
  0xc5   :  { %1577 = vmatprep.mubr.bf16.mxu0 %v3846_v21  ;;  %1741 = vmatprep.mubr.bf16.mxu1 %v3846_v21  ;;  %v3748_v21 = vld [vmem:[%s4986_s3 + $0x150] ss:$12 sps:$4 sm:$0xff]  }
  0xc7   :  { %1548 = vmatpush1.bf16.msra.mxu0 %v3651_v16  ;;  %1712 = vmatpush1.bf16.msra.mxu1 %v3654_v11  ;;  %v3740_v16 = vld [vmem:[%s4986_s3 + $0x124] ss:$12 sps:$4 sm:$0xff]   ;;  %v3738_v11 = vld [vmem:[%s4986_s3 + $0x120] ss:$12 sps:$4 sm:$0xff]  }
  0xc8   :  { %1549 = vmatprep.subr.bf16.mxu0 %v3659_v17  ;;  %1713 = vmatprep.subr.bf16.mxu1 %v3662_v18  ;;  %v3745_v17 = vld [vmem:[%s4986_s3 + $0x13c] ss:$12 sps:$4 sm:$0xff]   ;;  %v3743_v18 = vld [vmem:[%s4986_s3 + $0x138] ss:$12 sps:$4 sm:$0xff]  }
  0xcb   :  { %1550 = vmatpush1.bf16.msra.mxu0 %v3657_v19  ;;  %1714 = vmatpush1.bf16.msra.mxu1 %v3660_v20  ;;  %v3750_v19 = vld [vmem:[%s4986_s3 + $0x154] ss:$12 sps:$4 sm:$0xff]   ;;  %v3751_v20 = vld [vmem:[%s4986_s3 + $0x158] ss:$12 sps:$4 sm:$0xff]  }
  0xcc   :  { %1551 = vmatprep.subr.bf16.mxu0 %v3665_v22  ;;  %1715 = vmatprep.subr.bf16.mxu1 %v3668_v23  ;;  %v3752_v22 = vld [vmem:[%s4986_s3 + $0x98] ss:$12 sps:$4 sm:$0xff]  }
  0xcd   :  { %v3755_v23 = vld [vmem:[%s4986_s3 + $0x16c] ss:$12 sps:$4 sm:$0xff]  }
  0xcf   :  { %1552 = vmatpush1.bf16.msra.mxu0 %v3663_v24  ;;  %1716 = vmatpush1.bf16.msra.mxu1 %v3666_v25  ;;  %v3756_v24 = vld [vmem:[%s4986_s3 + $0x170] ss:$12 sps:$4 sm:$0xff]   ;;  %v3753_v25 = vld [vmem:[%s4986_s3 + $0x168] ss:$12 sps:$4 sm:$0xff]  }
  0xd0   :  { %1553 = vmatprep.subr.bf16.mxu0 %v3671_v26  ;;  %1717 = vmatprep.subr.bf16.mxu1 %v3674_v27  ;;  %v3757_v26 = vld [vmem:[%s4986_s3 + $0xb0] ss:$12 sps:$4 sm:$0xff]  }
  0xd1   :  { %v3760_v27 = vld [vmem:[%s4986_s3 + $0x184] ss:$12 sps:$4 sm:$0xff]  }
  0xd3   :  { %1554 = vmatpush1.bf16.msra.mxu0 %v3669_v28  ;;  %1718 = vmatpush1.bf16.msra.mxu1 %v3672_v29  ;;  %v3761_v28 = vld [vmem:[%s4986_s3 + $0x248] ss:$12 sps:$4 sm:$0xff]   ;;  %v257_v29 = vlaneseq }
  0xd4   :  { %1555 = vmatprep.subr.bf16.mxu0 %v3677_v30  ;;  %1719 = vmatprep.subr.bf16.mxu1 %v3680_v31 }
  0xd5   :  { %v4735_v30 = vshrl.u32 %v257_v29, 7  ;;  %v3801_v29 = vld [vmem:[%s4986_s3 + $0x258] ss:$12 sps:$4 sm:$0xff]  }
  0xd7   :  { %1556 = vmatpush1.bf16.msra.mxu0 %v3675_v32  ;;  %1720 = vmatpush1.bf16.msra.mxu1 %v3678_v33  ;;  %v259_v31 = vsub.s32 0, %v4735_v30  ;;  %v4741_v32 = vld [vmem:[%s4987_s2] sm:$0xf]  ;;  %v263_v33 = vsub.s32 1, %v4735_v30 }
  0xd8   :  { %1557 = vmatprep.subr.bf16.mxu0 %v3683_v34  ;;  %1721 = vmatprep.subr.bf16.mxu1 %v3686_v35  ;;  %v271_v34 = vsub.s32 3, %v4735_v30 }
  0xd9   :  { %v260_v35 = vrot.slane %v4741_v32, %v259_v31 }
  0xdb   :  { %1558 = vmatpush1.bf16.msra.mxu0 %v3681_v36  ;;  %1722 = vmatpush1.bf16.msra.mxu1 %v3684_v37  ;;  %v264_v36 = vrot.slane %v4741_v32, %v263_v33  ;;  %v272_v37 = vrot.slane %v4741_v32, %v271_v34  ;;  %v3804_v34 = vld [vmem:[%s4986_s3 + $0x270] ss:$12 sps:$4 sm:$0xff]  }
  0xdc   :  { %1559 = vmatprep.subr.bf16.mxu0 %v3689_v38  ;;  %1723 = vmatprep.subr.bf16.mxu1 %v3692_v39 }
  0xdf   :  { %1560 = vmatpush1.bf16.msra.mxu0 %v3687_v40  ;;  %1724 = vmatpush1.bf16.msra.mxu1 %v3690_v41 }
  0xe0   :  { %2415 = vmatprep.subr.bf16.mxu0 %v3696_v42  ;;  %3219 = vmatprep.subr.bf16.mxu1 %v3721_v43 }
  0xe2   :  { %1578 = vmatmul.mubr.bf16.vlgmr.msra.gmra.mrb[0].mxu0 %v3693_v44  ;;  %1742 = vmatmul.mubr.bf16.vlgmr.msra.gmra.mrb[0].mxu1 %v3693_v44 }
  0xe3   :  { %2416 = vmatpush1.bf16.msra.mxu0 %v3694_v45  ;;  %3220 = vmatpush3.bf16.msra.mxu1 %v3722_v46 }
  0xe4   :  { %2417 = vmatprep.subr.bf16.mxu0 %v3699_v47  ;;  %3221 = vmatprep.subr.bf16.mxu1 %v3726_v48 }
  0xe7   :  { %2418 = vmatpush1.bf16.msra.mxu0 %v3697_v49  ;;  %3222 = vmatpush3.bf16.msra.mxu1 %v3727_v50 }
  0xe8   :  { %2419 = vmatprep.subr.bf16.mxu0 %v3702_v51  ;;  %3223 = vmatprep.subr.bf16.mxu1 %v3731_v52 }
  0xeb   :  { %2420 = vmatpush1.bf16.msra.mxu0 %v3700_v53  ;;  %3224 = vmatpush3.bf16.msra.mxu1 %v3732_v54  ;;  %v3758_v53 = vld [vmem:[%s4986_s3 + $0x180] ss:$12 sps:$4 sm:$0xff]   ;;  %v3762_v54 = vld [vmem:[%s4986_s3 + $0x188] ss:$12 sps:$4 sm:$0xff]  }
  0xec   :  { %2421 = vmatprep.subr.bf16.mxu0 %v3705_v55  ;;  %3225 = vmatprep.subr.bf16.mxu1 %v3736_v56  ;;  %v3765_v56 = vld [vmem:[%s4986_s3 + $0x19c] ss:$12 sps:$4 sm:$0xff]  }
  0xef   :  { %2422 = vmatpush1.bf16.msra.mxu0 %v3703_v57  ;;  %3226 = vmatpush3.bf16.msra.mxu1 %v3737_v58  ;;  %v3766_v57 = vld [vmem:[%s4986_s3 + $0x260] ss:$12 sps:$4 sm:$0xff]  }
  0xf0   :  { %2423 = vmatprep.subr.bf16.mxu0 %v3708_v59  ;;  %3227 = vmatprep.subr.bf16.mxu1 %v3741_v60  ;;  %v3763_v59 = vld [vmem:[%s4986_s3 + $0x198] ss:$12 sps:$4 sm:$0xff]   ;;  %v3767_v60 = vld [vmem:[%s4986_s3 + $0x1a0] ss:$12 sps:$4 sm:$0xff]  }
  0xf3   :  { %2424 = vmatpush1.bf16.msra.mxu0 %v3706_v61  ;;  %3228 = vmatpush3.bf16.msra.mxu1 %v3742_v62  ;;  %v3770_v61 = vld [vmem:[%s4986_s3 + $0x1b4] ss:$12 sps:$4 sm:$0xff]   ;;  %v3771_v62 = vld [vmem:[%s4986_s3 + $0x278] ss:$12 sps:$4 sm:$0xff]  }
  0xf4   :  { %2425 = vmatprep.subr.bf16.mxu0 %v3711_v63  ;;  %3229 = vmatprep.subr.bf16.mxu1 %v3746_v0  ;;  %v3768_v63 = vld [vmem:[%s4986_s3 + $0x1b0] ss:$12 sps:$4 sm:$0xff]   ;;  %v3772_v0 = vld [vmem:[%s4986_s3 + $0x1b8] ss:$12 sps:$4 sm:$0xff]  }
  0xf7   :  { %2426 = vmatpush1.bf16.msra.mxu0 %v3709_v1  ;;  %3230 = vmatpush3.bf16.msra.mxu1 %v3747_v2  ;;  %v3775_v1 = vld [vmem:[%s4986_s3 + $0x1cc] ss:$12 sps:$4 sm:$0xff]   ;;  %v3776_v2 = vld [vmem:[%s4986_s3 + $0x290] ss:$12 sps:$4 sm:$0xff]  }
  0xf8   :  { %2427 = vmatprep.subr.bf16.mxu0 %v3714_v3  ;;  %3231 = vmatprep.subr.bf16.mxu1 %v3751_v20  ;;  %v3773_v3 = vld [vmem:[%s4986_s3 + $0x1c8] ss:$12 sps:$4 sm:$0xff]   ;;  %v3795_v20 = vld [vmem:[%s4986_s3 + $0x22c] ss:$12 sps:$4 sm:$0xff]  }
  0xfb   :  { %2428 = vmatpush1.bf16.msra.mxu0 %v3712_v4  ;;  %3232 = vmatpush3.bf16.msra.mxu1 %v3752_v22  ;;  %v3777_v4 = vld [vmem:[%s4986_s3 + $0x1d0] ss:$12 sps:$4 sm:$0xff]   ;;  %v3793_v22 = vld [vmem:[%s4986_s3 + $0x228] ss:$12 sps:$4 sm:$0xff]  }
  0xfc   :  { %2429 = vmatprep.subr.bf16.mxu0 %v3717_v5  ;;  %3233 = vmatprep.subr.bf16.mxu1 %v3756_v24  ;;  %v3780_v5 = vld [vmem:[%s4986_s3 + $0x1e4] ss:$12 sps:$4 sm:$0xff]  }
  0xff   :  { %2430 = vmatpush1.bf16.msra.mxu0 %v3715_v6  ;;  %3234 = vmatpush3.bf16.msra.mxu1 %v3757_v26  ;;  %v3781_v6 = vld [vmem:[%s4986_s3 + $0x2a8] ss:$12 sps:$4 sm:$0xff]   ;;  %v3798_v26 = vld [vmem:[%s4986_s3 + $0x240] ss:$12 sps:$4 sm:$0xff]  }
 0x100   :  { %2431 = vmatprep.subr.bf16.mxu0 %v3720_v7  ;;  %3241 = vmatprep.subr.bf16.mxu1 %v3761_v28  ;;  %v3778_v7 = vld [vmem:[%s4986_s3 + $0x1e0] ss:$12 sps:$4 sm:$0xff]   ;;  %v3803_v28 = vld [vmem:[%s4986_s3 + $0x25c] ss:$12 sps:$4 sm:$0xff]  }
 0x103   :  { %2432 = vmatpush1.bf16.msra.mxu0 %v3718_v8  ;;  %v3782_v8 = vld [vmem:[%s4986_s3 + $0x1e8] ss:$12 sps:$4 sm:$0xff]  }
 0x104   :  { %2433 = vmatprep.subr.bf16.mxu0 %v3725_v9  ;;  %v267_v9 = vsub.s32 2, %v4735_v30  ;;  %v3839_v30 = vld [vmem:[%s4988_s5 + $0x88] sm:$0xff]  }
 0x107   :  { %2434 = vmatpush1.bf16.msra.mxu0 %v3723_v10  ;;  %v3785_v10 = vld [vmem:[%s4986_s3 + $0x1fc] ss:$12 sps:$4 sm:$0xff]  }
 0x108   :  { %2435 = vmatprep.subr.bf16.mxu0 %v3730_v12  ;;  %v3786_v12 = vld [vmem:[%s4986_s3 + $0x2c0] ss:$12 sps:$4 sm:$0xff]  }
 0x10b   :  { %2436 = vmatpush1.bf16.msra.mxu0 %v3728_v13  ;;  %v3783_v13 = vld [vmem:[%s4986_s3 + $0x1f8] ss:$12 sps:$4 sm:$0xff]  }
 0x10c   :  { %2437 = vmatprep.subr.bf16.mxu0 %v3735_v14  ;;  %v3787_v14 = vld [vmem:[%s4986_s3 + $0x200] ss:$12 sps:$4 sm:$0xff]  }
 0x10f   :  { %2438 = vmatpush1.bf16.msra.mxu0 %v3733_v15  ;;  %v268_v15 = vrot.slane %v4741_v32, %v267_v9  ;;  %v3806_v32 = vld [vmem:[%s4986_s3 + $0x274] ss:$12 sps:$4 sm:$0xff]  }
 0x110   :  { %2439 = vmatprep.subr.bf16.mxu0 %v3740_v16  ;;  %v3790_v16 = vld [vmem:[%s4986_s3 + $0x214] ss:$12 sps:$4 sm:$0xff]  }
 0x113   :  { %2440 = vmatpush1.bf16.msra.mxu0 %v3738_v11  ;;  %v3791_v11 = vld [vmem:[%s4986_s3 + $0x2d8] ss:$12 sps:$4 sm:$0xff]  }
 0x114   :  { %2441 = vmatprep.subr.bf16.mxu0 %v3745_v17  ;;  %v3788_v17 = vld [vmem:[%s4986_s3 + $0x210] ss:$12 sps:$4 sm:$0xff]  }
 0x117   :  { %2442 = vmatpush1.bf16.msra.mxu0 %v3743_v18  ;;  %v3792_v18 = vld [vmem:[%s4986_s3 + $0x218] ss:$12 sps:$4 sm:$0xff]  }
 0x118   :  { %2443 = vmatprep.subr.bf16.mxu0 %v3750_v19 }
 0x11b   :  { %2444 = vmatpush1.bf16.msra.mxu0 %v3748_v21  ;;  %v3796_v21 = vld [vmem:[%s4986_s3 + $0x2f0] ss:$12 sps:$4 sm:$0xff]  }
 0x11c   :  { %2445 = vmatprep.subr.bf16.mxu0 %v3755_v23  ;;  %v3797_v23 = vld [vmem:[%s4986_s3 + $0x230] ss:$12 sps:$4 sm:$0xff]  }
 0x11f   :  { %2446 = vmatpush1.bf16.msra.mxu0 %v3753_v25  ;;  %v3800_v25 = vld [vmem:[%s4986_s3 + $0x244] ss:$12 sps:$4 sm:$0xff]  }
 0x120   :  { %2456 = vmatprep.subr.bf16.mxu0 %v3760_v27 }
 0x1b5   :  { %v1579_v38 = vpop.f32.mrb[0].mxu0  ;;  %v4752_v39 = vpop.f32.mrb[0].mxu1 }
 0x1b6   :  { %v3314_v40 = vadd.f32 %v1579_v38, %v260_v35  ;;  %v1581_v41 = vpop.f32.mrb[1].mxu0  ;;  %v1745_v42 = vpop.f32.mrb[1].mxu1  ;;  %v3316_v19 = vadd.f32 %v4752_v39, %v268_v15  ;;  %v3809_v35 = vld [vmem:[%s4986_s3 + $0x28c] ss:$12 sps:$4 sm:$0xff]   ;;  %v3815_v39 = vld [vmem:[%s4986_s3 + $0x2bc] ss:$12 sps:$4 sm:$0xff]  }
 0x1b7   :  { %v3315_v43 = vadd.f32 %v1581_v41, %v264_v36  ;;  %v3317_v44 = vadd.f32 %v1745_v42, %v272_v37  ;;  %v1583_v45 = vpop.f32.mrb[2].mxu0  ;;  %v1747_v46 = vpop.f32.mrb[2].mxu1  ;;  %v3807_v36 = vld [vmem:[%s4986_s3 + $0x288] ss:$12 sps:$4 sm:$0xff]   ;;  %v3812_v37 = vld [vmem:[%s4986_s3 + $0x2a4] ss:$12 sps:$4 sm:$0xff]  }
 0x1b8   :  { %v1750_v47 = vmax.f32 %v3314_v40, 0.0  ;;  %v1584_v48 = vpop.f32.mrb[3].mxu0  ;;  %v1748_v49 = vpop.f32.mrb[3].mxu1  ;;  %v1752_v24 = vmax.f32 %v3316_v19, 0.0  ;;  %v3810_v38 = vld [vmem:[%s4986_s3 + $0x2a0] ss:$12 sps:$4 sm:$0xff]  }
 0x1b9   :  { %v1751_v50 = vmax.f32 %v3315_v43, 0.0  ;;  %v1753_v51 = vmax.f32 %v3317_v44, 0.0  ;;  %v3813_v40 = vld [vmem:[%s4986_s3 + $0x2b8] ss:$12 sps:$4 sm:$0xff]   ;;  %v3818_v41 = vld [vmem:[%s4986_s3 + $0x2d4] ss:$12 sps:$4 sm:$0xff]  }
 0x1ba   :  { %v1754_v55 = vpack.c.bf16 %v1750_v47, %v1750_v47  ;;  %v1756_v27 = vpack.c.bf16 %v1752_v24, %v1752_v24  ;;  %v3816_v42 = vld [vmem:[%s4986_s3 + $0x2d0] ss:$12 sps:$4 sm:$0xff]   ;;  %v3821_v43 = vld [vmem:[%s4986_s3 + $0x2ec] ss:$12 sps:$4 sm:$0xff]   ;;  %v3819_v44 = vld [vmem:[%s4986_s3 + $0x2e8] ss:$12 sps:$4 sm:$0xff]  }
 0x1bb   :  { %v1755_v52 = vpack.c.bf16 %v1751_v50, %v1751_v50  ;;  %v1757_v58 = vpack.c.bf16 %v1753_v51, %v1753_v51  ;;  %v3822_v45 = vld [vmem:[%s4988_s5 + $0x40] sm:$0xff]   ;;  %v3824_v47 = vld [vmem:[%s4988_s5 + $0x48] sm:$0xff]   ;;  %v3826_v49 = vld [vmem:[%s4988_s5 + $0x50] sm:$0xff]  }
 0x1bc   :  { %v3823_v46 = vld [vmem:[%s4988_s5] sm:$0xff]   ;;  %v3825_v48 = vld [vmem:[%s4988_s5 + $0x8] sm:$0xff]   ;;  %v3827_v50 = vld [vmem:[%s4988_s5 + $0x10] sm:$0xff]  }
 0x1bd   :  { %2447 = vmatprep.mubr.bf16.mxu0 %v1755_v52  ;;  %2529 = vmatprep.mubr.bf16.mxu1 %v1755_v52  ;;  %v3828_v51 = vld [vmem:[%s4988_s5 + $0x58] sm:$0xff]  }
 0x1be   :  { %2448 = vmatmul.mubr.bf16.vlgmr.msra.gmra.mrb[4].mxu0 %v1754_v55  ;;  %2530 = vmatmul.mubr.bf16.vlgmr.msra.gmra.mrb[4].mxu1 %v1754_v55  ;;  %v3829_v52 = vld [vmem:[%s4988_s5 + $0x18] sm:$0xff]   ;;  %v3832_v55 = vld [vmem:[%s4988_s5 + $0x68] sm:$0xff]  }
 0x1bf   :  { %2457 = vmatpush1.bf16.msra.mxu0 %v3758_v53  ;;  %3242 = vmatpush3.bf16.msra.mxu1 %v3762_v54  ;;  %v3830_v53 = vld [vmem:[%s4988_s5 + $0x60] sm:$0xff]  }
 0x1c0   :  { %2488 = vmatprep.mubr.bf16.mxu0 %v1757_v58  ;;  %2569 = vmatprep.mubr.bf16.mxu1 %v1757_v58  ;;  %v3831_v54 = vld [vmem:[%s4988_s5 + $0x20] sm:$0xff]   ;;  %v3835_v58 = vld [vmem:[%s4988_s5 + $0x30] sm:$0xff]  }
 0x1c1   :  { %2458 = vmatprep.subr.bf16.mxu0 %v3765_v56  ;;  %3243 = vmatprep.subr.bf16.mxu1 %v3766_v57  ;;  %v3833_v56 = vld [vmem:[%s4988_s5 + $0x28] sm:$0xff]   ;;  %v3834_v57 = vld [vmem:[%s4988_s5 + $0x70] sm:$0xff]  }
 0x1c3   :  { %2459 = vmatpush1.bf16.msra.mxu0 %v3763_v59  ;;  %3244 = vmatpush3.bf16.msra.mxu1 %v3767_v60  ;;  %v3836_v59 = vld [vmem:[%s4988_s5 + $0x78] sm:$0xff]  }
 0x1c4   :  { %2460 = vmatprep.subr.bf16.mxu0 %v3770_v61  ;;  %3245 = vmatprep.subr.bf16.mxu1 %v3771_v62  ;;  %v3837_v60 = vld [vmem:[%s4988_s5 + $0x38] sm:$0xff]   ;;  %v3847_v61 = vmov 0.0  }
 0x1c7   :  { %2461 = vmatpush1.bf16.msra.mxu0 %v3768_v63  ;;  %3246 = vmatpush3.bf16.msra.mxu1 %v3772_v0 }
 0x1c8   :  { %2462 = vmatprep.subr.bf16.mxu0 %v3775_v1  ;;  %3247 = vmatprep.subr.bf16.mxu1 %v3776_v2 }
 0x1cb   :  { %2463 = vmatpush1.bf16.msra.mxu0 %v3773_v3  ;;  %3248 = vmatpush3.bf16.msra.mxu1 %v3777_v4  ;;  %v1886_v3 = vld [vmem:[%s4989_s4] sm:$0x7] }
 0x1cc   :  { %2464 = vmatprep.subr.bf16.mxu0 %v3780_v5  ;;  %3249 = vmatprep.subr.bf16.mxu1 %v3781_v6  ;;  %v1899_v4 = vrot.slane %v1886_v3, %v267_v9  ;;  %v1895_v15 = vrot.slane %v1886_v3, %v263_v33  ;;  %v3841_v33 = vld [vmem:[%s4988_s5 + $0x98] sm:$0xff]  }
 0x1cf   :  { %2465 = vmatpush1.bf16.msra.mxu0 %v3778_v7  ;;  %3250 = vmatpush3.bf16.msra.mxu1 %v3782_v8 }
 0x1d0   :  { %2466 = vmatprep.subr.bf16.mxu0 %v3785_v10  ;;  %3251 = vmatprep.subr.bf16.mxu1 %v3786_v12 }
 0x1d3   :  { %2467 = vmatpush1.bf16.msra.mxu0 %v3783_v13  ;;  %3252 = vmatpush3.bf16.msra.mxu1 %v3787_v14  ;;  %v1891_v14 = vrot.slane %v1886_v3, %v259_v31  ;;  %v3840_v31 = vld [vmem:[%s4988_s5 + $0x90] sm:$0xff]  }
 0x1d4   :  { %2468 = vmatprep.subr.bf16.mxu0 %v3790_v16  ;;  %3253 = vmatprep.subr.bf16.mxu1 %v3791_v11 }
 0x1d7   :  { %2469 = vmatpush1.bf16.msra.mxu0 %v3788_v17  ;;  %3254 = vmatpush3.bf16.msra.mxu1 %v3792_v18 }
 0x1d8   :  { %2470 = vmatprep.subr.bf16.mxu0 %v3795_v20  ;;  %3255 = vmatprep.subr.bf16.mxu1 %v3796_v21 }
 0x1db   :  { %2471 = vmatpush1.bf16.msra.mxu0 %v3793_v22  ;;  %3256 = vmatpush3.bf16.msra.mxu1 %v3797_v23  ;;  %v3838_v23 = vld [vmem:[%s4988_s5 + $0x80] sm:$0xff]  }
 0x1dc   :  { %2472 = vmatprep.subr.bf16.mxu0 %v3800_v25  ;;  %3263 = vmatprep.subr.bf16.mxu1 %v3822_v45  ;;  %v3842_v25 = vld [vmem:[%s4988_s5 + $0xa0] sm:$0xff]  }
 0x1de   :  { %2570 = vmatmul.mubr.bf16.vlgmr.msra.gmra.mrb[8].mxu1 %v1756_v27 }
 0x1df   :  { %2473 = vmatpush1.bf16.msra.mxu0 %v3798_v26  ;;  %3264 = vmatpush3.bf16.msra.mxu1 %v3823_v46  ;;  %v3843_v26 = vld [vmem:[%s4988_s5 + $0xa8] sm:$0xff]  }
 0x1e0   :  { %2474 = vmatprep.subr.bf16.mxu0 %v3803_v28  ;;  %3265 = vmatprep.subr.bf16.mxu1 %v3824_v47  ;;  %v3845_v28 = vld [vmem:[%s4988_s5 + $0xb8] sm:$0xff]  }
 0x1e3   :  { %2475 = vmatpush1.bf16.msra.mxu0 %v3801_v29  ;;  %3266 = vmatpush3.bf16.msra.mxu1 %v3825_v48 }
 0x1e4   :  { %2476 = vmatprep.subr.bf16.mxu0 %v3806_v32  ;;  %3267 = vmatprep.subr.bf16.mxu1 %v3826_v49 }
 0x1e7   :  { %2477 = vmatpush1.bf16.msra.mxu0 %v3804_v34  ;;  %3268 = vmatpush3.bf16.msra.mxu1 %v3827_v50 }
 0x1e8   :  { %2478 = vmatprep.subr.bf16.mxu0 %v3809_v35  ;;  %3269 = vmatprep.subr.bf16.mxu1 %v3828_v51 }
 0x1eb   :  { %2479 = vmatpush1.bf16.msra.mxu0 %v3807_v36  ;;  %3270 = vmatpush3.bf16.msra.mxu1 %v3829_v52 }
 0x1ec   :  { %2480 = vmatprep.subr.bf16.mxu0 %v3812_v37  ;;  %3271 = vmatprep.subr.bf16.mxu1 %v3830_v53 }
 0x1ef   :  { %2481 = vmatpush1.bf16.msra.mxu0 %v3810_v38  ;;  %3272 = vmatpush3.bf16.msra.mxu1 %v3831_v54 }
 0x1f0   :  { %2482 = vmatprep.subr.bf16.mxu0 %v3815_v39  ;;  %3273 = vmatprep.subr.bf16.mxu1 %v3832_v55  ;;  %v3194_v39 = vld [vmem:[%s4990_s6] ss:$0 sm:$0xff] }
 0x1f3   :  { %2483 = vmatpush1.bf16.msra.mxu0 %v3813_v40  ;;  %3274 = vmatpush3.bf16.msra.mxu1 %v3833_v56 }
 0x1f4   :  { %2484 = vmatprep.subr.bf16.mxu0 %v3818_v41  ;;  %3275 = vmatprep.subr.bf16.mxu1 %v3834_v57 }
 0x1f7   :  { %2485 = vmatpush1.bf16.msra.mxu0 %v3816_v42  ;;  %3276 = vmatpush3.bf16.msra.mxu1 %v3835_v58 }
 0x1f8   :  { %2486 = vmatprep.subr.bf16.mxu0 %v3821_v43  ;;  %3277 = vmatprep.subr.bf16.mxu1 %v3836_v59 }
 0x1fb   :  { %2487 = vmatpush1.bf16.msra.mxu0 %v3819_v44  ;;  %3278 = vmatpush3.bf16.msra.mxu1 %v3837_v60 }
 0x1fc   :  { %3294 = vmatprep.subr.bf16.mxu1 %v3847_v61 }
 0x1fe   :  { %2489 = vmatmul.mubr.bf16.vlgmr.msra.gmra.mrb[4].mxu0 %v1756_v27  ;;  %v3844_v27 = vld [vmem:[%s4988_s5 + $0xb0] sm:$0xff]  }
 0x291   :  { %v3235_v62 = vpop.f32.mrb[4].mxu1 }
 0x292   :  { %v3236_v63 = vpop.f32.mrb[5].mxu1 }
 0x293   :  { %v3237_v0 = vadd.f32 %v3236_v63, %v3235_v62  ;;  %v3238_v1 = vpop.f32.mrb[6].mxu1 }
 0x294   :  { %v3239_v2 = vpop.f32.mrb[7].mxu1 }
 0x295   :  { %v2532_v7 = vadd.f32 %v3237_v0, %v1899_v4 }
 0x2b1   :  { %v3257_v5 = vpop.f32.mrb[8].mxu1 }
 0x2b2   :  { %v3258_v6 = vpop.f32.mrb[9].mxu1 }
 0x2b3   :  { %v3259_v8 = vadd.f32 %v3258_v6, %v3257_v5  ;;  %v3260_v10 = vpop.f32.mrb[10].mxu1 }
 0x2b4   :  { %v3261_v12 = vpop.f32.mrb[11].mxu1 }
 0x2b5   :  { %v2572_v13 = vadd.f32 %v3259_v8, %v2532_v7 }
 0x2b7   :  { %v2579_v29 = vmax.f32 %v2572_v13, 0.0 }
 0x2b9   :  { %v2582_v32 = vpack.c.bf16 %v2579_v29, %v2579_v29 }
 0x2d1   :  { %v2490_v16 = vpop.f32.mrb[4].mxu0 }
 0x2d2   :  { %v3318_v11 = vadd.f32 %v2490_v16, %v1891_v14  ;;  %v2492_v17 = vpop.f32.mrb[5].mxu0 }
 0x2d3   :  { %v3319_v18 = vadd.f32 %v2492_v17, %v1895_v15  ;;  %v2494_v19 = vpop.f32.mrb[6].mxu0 }
 0x2d4   :  { %v2577_v20 = vmax.f32 %v3318_v11, 0.0  ;;  %v2495_v9 = vpop.f32.mrb[7].mxu0 }
 0x2d5   :  { %v2578_v21 = vmax.f32 %v3319_v18, 0.0 }
 0x2d6   :  { %v2580_v24 = vpack.c.bf16 %v2577_v20, %v2577_v20 }
 0x2d7   :  { %v2581_v22 = vpack.c.bf16 %v2578_v21, %v2578_v21 }
 0x2d9   :  { %2814 = vmatprep.mubr.bf16.mxu1 %v2581_v22 }
 0x2da   :  { %2815 = vmatmul.mubr.bf16.vlgmr.msra.gmra.mrb[12].mxu1 %v2580_v24 }
 0x2db   :  { %3295 = vmatpush3.bf16.msra.mxu1 %v3838_v23  ;;  %3310 = vmatprep.mubr.msk.bf16.mxu1 %vm3848_vm0, %v3847_v61 }
 0x2dc   :  { %3296 = vmatprep.subr.bf16.mxu1 %v3847_v61 }
 0x2df   :  { %3297 = vmatpush3.bf16.msra.mxu1 %v3839_v30 }
 0x2e0   :  { %3298 = vmatprep.subr.bf16.mxu1 %v3847_v61 }
 0x2e3   :  { %3299 = vmatpush3.bf16.msra.mxu1 %v3840_v31 }
 0x2e4   :  { %3300 = vmatprep.subr.bf16.mxu1 %v3847_v61 }
 0x2e7   :  { %3301 = vmatpush3.bf16.msra.mxu1 %v3841_v33 }
 0x2e8   :  { %3302 = vmatprep.subr.bf16.mxu1 %v3847_v61 }
 0x2eb   :  { %3303 = vmatpush3.bf16.msra.mxu1 %v3842_v25 }
 0x2ec   :  { %3304 = vmatprep.subr.bf16.mxu1 %v3847_v61 }
 0x2ef   :  { %3305 = vmatpush3.bf16.msra.mxu1 %v3843_v26 }
 0x2f0   :  { %3306 = vmatprep.subr.bf16.mxu1 %v3847_v61 }
 0x2f3   :  { %3307 = vmatpush3.bf16.msra.mxu1 %v3844_v27 }
 0x2f4   :  { %3308 = vmatprep.subr.bf16.mxu1 %v3847_v61 }
 0x2f7   :  { %3309 = vmatpush3.bf16.msra.mxu1 %v3845_v28 }
 0x2fa   :  { %3311 = vmatmul.mubr.bf16.vlgmr.msra.gmra.mrb[16].mxu1 %v2582_v32 }
 0x3ad   :  { %v3279_v34 = vpop.f32.mrb[12].mxu1 }
 0x3ae   :  { %v3280_v35 = vpop.f32.mrb[13].mxu1 }
 0x3af   :  { %v3281_v36 = vadd.f32 %v3280_v35, %v3279_v34  ;;  %v3282_v37 = vpop.f32.mrb[14].mxu1 }
 0x3b0   :  { %v3283_v38 = vpop.f32.mrb[15].mxu1 }
 0x3b1   :  { %v2817_v40 = vadd.f32 %v3281_v36, %v3194_v39 }
 0x3cd   :  { %v2856_v41 = vpop.f32.mrb[16].mxu1 }
 0x3ce   :  { %v2857_v42 = vadd.f32 %v2856_v41, %v2817_v40  ;;  %v3312_v43 = vpop.f32.mrb[17].mxu1 }
 0x3cf   :  { %v2859_v44 = vpop.f32.mrb[18].mxu1 }
 0x3d0   :  { %2862 = vst [vmem:[%s4991_s7] sm:$0xff] %v2857_v42  ;;  %v3313_v45 = vpop.f32.mrb[19].mxu1 }

</bundles_post_ra>
